<compile_context>
chip_gen: v6e
topology: v6e:2x2x1
jax: 0.10.0
libtpu: 0.0.40
codegen_flags: <defaults>
</compile_context>

<pallas_src>
import functools
import jax
import jax.numpy as jnp
from jax import lax
from jax.experimental import pallas as pl
from jax.experimental.pallas import tpu as pltpu

LN_EPS = 1e-5  # torch.nn.LayerNorm default


def _round_up(x, m):
    return (x + m - 1) // m * m


def _pad_to(a, shape):
    pads = [(0, t - s) for s, t in zip(a.shape, shape)]
    if all(p == (0, 0) for p in pads):
        return a
    return jnp.pad(a, pads)


def _physical_vmem_bytes():
    try:
        return int(pltpu.get_tpu_info().vmem_capacity_bytes)
    except Exception:
        return 64 << 20  # conservative: v7x per-TensorCore VMEM


def _layernorm(x, gamma, beta, n):
    """Fused one-pass LayerNorm over the last dim with a true feature count `n`.

    mean = sum/n, var = E[x^2] - mean^2 (biased, matches torch).  Padded (zero) lanes do not
    perturb the sums; padded gamma/beta are zero so padded output lanes stay exactly 0.
    Used for the hidden LNs (post-activation values are well conditioned).
    """
    inv_n = 1.0 / float(n)
    s = jnp.sum(x, axis=-1, keepdims=True)
    ss = jnp.sum(x * x, axis=-1, keepdims=True)
    mean = s * inv_n
    var = ss * inv_n - mean * mean
    inv = lax.rsqrt(var + LN_EPS)
    return (x - mean) * inv * gamma + beta


def _layernorm_first(x, gamma, beta, n):
    """Two-pass, lane-masked LayerNorm for the feature norm on raw observations.

    Avoids E[x^2]-mean^2 catastrophic cancellation.  Masking keeps padded lanes out of the
    centered sum; padded gamma/beta are zero so padded output lanes stay exactly 0.
    """
    n_pad = x.shape[-1]
    inv_n = 1.0 / float(n)
    mean = jnp.sum(x, axis=-1, keepdims=True) * inv_n
    xc = x - mean
    if n_pad != n:
        lane = lax.broadcasted_iota(jnp.int32, x.shape, x.ndim - 1)
        xc = jnp.where(lane < n, xc, 0.0)
    var = jnp.sum(xc * xc, axis=-1, keepdims=True) * inv_n
    inv = lax.rsqrt(var + LN_EPS)
    return xc * inv * gamma + beta


def mlp_base_kernel(*refs, layer_N, use_relu, use_feature_norm,
                    obs_dim, hidden, matmul_dtype, stream_w2):
    it = iter(refs)
    x_ref = next(it)
    if use_feature_norm:
        fng_ref, fnb_ref = next(it), next(it)
    w1_ref, b1_ref, g1_ref, be1_ref = next(it), next(it), next(it), next(it)
    if layer_N > 0:
        w2_ref, b2_ref, g2_ref, be2_ref = next(it), next(it), next(it), next(it)
    o_ref = next(it)
    if stream_w2:
        w2_buf, w2_sem, h_scr = next(it), next(it), next(it)

    act = (lambda v: jnp.maximum(v, 0.0)) if use_relu else jnp.tanh

    if stream_w2:
        def fetch(i, slot):
            pltpu.make_async_copy(w2_ref.at[i], w2_buf.at[slot], w2_sem.at[slot]).start()
        # Kick off layer-0 weight DMA immediately so it overlaps feature-LN + fc1.
        fetch(0, 0)

    x = x_ref[...].astype(jnp.float32)
    if use_feature_norm:
        x = _layernorm_first(x, fng_ref[...], fnb_ref[...], obs_dim)

    # fc1: Linear -> act -> LayerNorm (MXU matmul in matmul_dtype, f32 accumulation).
    h = jnp.dot(x.astype(matmul_dtype), w1_ref[...],
                preferred_element_type=jnp.float32) + b1_ref[...]
    h = _layernorm(act(h), g1_ref[...], be1_ref[...], hidden)

    if layer_N == 0:
        o_ref[...] = h.astype(o_ref.dtype)
        return

    if stream_w2:
        # Deep-stack path: only 2 layers of weights live in VMEM; prefetch i+1 during layer i.
        h_scr[...] = h

        @pl.loop(0, layer_N)
        def _(i):
            slot = i % 2
            pltpu.make_async_copy(w2_ref.at[i], w2_buf.at[slot], w2_sem.at[slot]).wait()

            @pl.when(i + 1 < layer_N)
            def _():
                fetch(i + 1, 1 - slot)

            h2 = jnp.dot(h_scr[...].astype(matmul_dtype), w2_buf[slot],
                         preferred_element_type=jnp.float32) + b2_ref[i]
            h_scr[...] = _layernorm(act(h2), g2_ref[i], be2_ref[i], hidden)

        o_ref[...] = h_scr[...].astype(o_ref.dtype)
    else:
        def layer(i, h):
            h2 = jnp.dot(h.astype(matmul_dtype), w2_ref[i],
                         preferred_element_type=jnp.float32) + b2_ref[i]
            return _layernorm(act(h2), g2_ref[i], be2_ref[i], hidden)

        if layer_N <= 4:
            for i in range(layer_N):       # short fixed depth: static unroll
                h = layer(i, h)
        else:
            # Partial unroll: overlap next layer's MXU pushes with previous LN epilogue,
            # while keeping vreg live ranges bounded.
            h = jax.lax.fori_loop(0, layer_N, layer, h, unroll=2)
        o_ref[...] = h.astype(o_ref.dtype)


def _vmem_estimate(TB, D_pad, H_pad, layer_N, w_item, x_item, out_item, *,
                   resident, buffer_factor):
    w1 = D_pad * H_pad * w_item * buffer_factor
    if layer_N > 0 and resident:
        w2 = layer_N * H_pad * H_pad * w_item * buffer_factor
        stream_scratch = 0
    else:
        w2 = 0
        stream_scratch = (2 * H_pad * H_pad * w_item + TB * H_pad * 4) if layer_N > 0 else 0
    vecs = (2 * D_pad + (3 + 3 * max(layer_N, 0)) * H_pad) * 4 * buffer_factor
    acts = 2 * (TB * D_pad * x_item + TB * H_pad * out_item)   # double-buffered I/O tiles
    inter = 3 * TB * H_pad * 4                                  # live f32 intermediates / spill
    return int(w1 + w2 + vecs + stream_scratch + acts + inter + (4 << 20))


def prepare_params(params, *, layer_N, use_feature_norm=True, matmul_dtype=jnp.bfloat16):
    """One-time host-side prep: pad to lane-dense (multiples of 128) and cast weights once.

    Keeps per-call wrappers from re-padding / re-casting weights through HBM on every forward.
    """
    D, H = params["w1"].shape
    D_pad, H_pad = _round_up(D, 128), _round_up(H, 128)
    prep = {
        "obs_dim": D, "hidden": H, "D_pad": D_pad, "H_pad": H_pad,
        "layer_N": layer_N, "use_feature_norm": use_feature_norm,
        "matmul_dtype": matmul_dtype,
        "w1": _pad_to(params["w1"], (D_pad, H_pad)).astype(matmul_dtype),
        "b1": _pad_to(params["b1"], (1, H_pad)).astype(jnp.float32),
        "g1": _pad_to(params["g1"], (1, H_pad)).astype(jnp.float32),
        "be1": _pad_to(params["be1"], (1, H_pad)).astype(jnp.float32),
    }
    if use_feature_norm:
        prep["fn_g"] = _pad_to(params["fn_g"], (1, D_pad)).astype(jnp.float32)
        prep["fn_b"] = _pad_to(params["fn_b"], (1, D_pad)).astype(jnp.float32)
    if layer_N > 0:
        prep["w2"] = _pad_to(params["w2"], (layer_N, H_pad, H_pad)).astype(matmul_dtype)
        prep["b2"] = _pad_to(params["b2"], (layer_N, 1, H_pad)).astype(jnp.float32)
        prep["g2"] = _pad_to(params["g2"], (layer_N, 1, H_pad)).astype(jnp.float32)
        prep["be2"] = _pad_to(params["be2"], (layer_N, 1, H_pad)).astype(jnp.float32)
    return prep


def mlp_base_forward(x, prepared, *, use_relu=True, batch_tile=512,
                     out_dtype=jnp.float32, w2_resident=None):
    """Runs MLPBase.forward on a prepared parameter set.

    batch_tile defaults to 512 (good on v5e/v6e/v7x); it is shrunk automatically so the grid has
    at least 2 steps when the batch allows (megacore sharding + pipeline overlap).  Set
    out_dtype=jnp.bfloat16 if the consumer tolerates it (halves output writeback).
    w2_resident=None chooses automatically between keeping the whole w2 stack in VMEM and
    streaming it from HBM with a manual double-buffer (deep stacks on v7x).
    """
    layer_N = prepared["layer_N"]
    use_feature_norm = prepared["use_feature_norm"]
    matmul_dtype = prepared["matmul_dtype"]
    D, H = prepared["obs_dim"], prepared["hidden"]
    D_pad, H_pad = prepared["D_pad"], prepared["H_pad"]

    B = x.shape[0]
    TB = _round_up(min(batch_tile, _round_up(B, 8)), 8)
    # Guarantee >= 2 grid steps when possible: engages both v7x TensorCores via the "parallel"
    # axis and gives the pipeline something to overlap the one-time weight fetch with.
    while TB > 8 and _round_up(B, TB) // TB < 2:
        TB = _round_up(max(TB // 2, 8), 8)
    B_pad = _round_up(B, TB)

    w_item = jnp.dtype(matmul_dtype).itemsize
    x_item = w_item                       # x is fed in matmul_dtype
    out_item = jnp.dtype(out_dtype).itemsize
    phys = _physical_vmem_bytes()

    if w2_resident is None:
        est_res = _vmem_estimate(TB, D_pad, H_pad, layer_N, w_item, x_item, out_item,
                                 resident=True, buffer_factor=1)
        w2_resident = (layer_N == 0) or (est_res <= int(0.7 * phys))
    stream_w2 = (layer_N > 0) and (not w2_resident)

    # bf16 input tile halves the per-step HBM->VMEM DMA; up-cast to f32 happens in-kernel.
    x_p = _pad_to(x.astype(matmul_dtype), (B_pad, D_pad))

    def build_and_call(single_buffer):
        def const_spec(shape):
            imap = (lambda i: (0, 0)) if len(shape) == 2 else (lambda i: (0, 0, 0))
            if single_buffer:
                # Constant index_map: single-buffer to halve resident weight VMEM.
                return pl.BlockSpec(shape, imap, pipeline_mode=pl.Buffered(1))
            return pl.BlockSpec(shape, imap)

        args = [x_p]
        in_specs = [pl.BlockSpec((TB, D_pad), lambda i: (i, 0))]
        if use_feature_norm:
            args += [prepared["fn_g"], prepared["fn_b"]]
            in_specs += [const_spec((1, D_pad)), const_spec((1, D_pad))]
        args += [prepared["w1"], prepared["b1"], prepared["g1"], prepared["be1"]]
        in_specs += [const_spec((D_pad, H_pad)), const_spec((1, H_pad)),
                     const_spec((1, H_pad)), const_spec((1, H_pad))]

        scratch_shapes = []
        if layer_N > 0:
            args += [prepared["w2"], prepared["b2"], prepared["g2"], prepared["be2"]]
            if w2_resident:
                in_specs += [const_spec((layer_N, H_pad, H_pad))]
            else:
                in_specs += [pl.BlockSpec(memory_space=pl.ANY)]   # raw HBM; manual DMA
                scratch_shapes = [pltpu.VMEM((2, H_pad, H_pad), matmul_dtype),
                                  pltpu.SemaphoreType.DMA((2,)),
                                  pltpu.VMEM((TB, H_pad), jnp.float32)]
            in_specs += [const_spec((layer_N, 1, H_pad))] * 3

        kernel = functools.partial(
            mlp_base_kernel,
            layer_N=layer_N, use_relu=use_relu, use_feature_norm=use_feature_norm,
            obs_dim=D, hidden=H, matmul_dtype=matmul_dtype, stream_w2=stream_w2)

        est = _vmem_estimate(TB, D_pad, H_pad, layer_N, w_item, x_item, out_item,
                             resident=w2_resident,
                             buffer_factor=1 if single_buffer else 2)
        vmem_limit = int(min(max(est, 32 << 20), int(phys * 0.85)))

        return pl.pallas_call(
            kernel,
            out_shape=jax.ShapeDtypeStruct((B_pad, H_pad), out_dtype),
            grid_spec=pltpu.PrefetchScalarGridSpec(
                num_scalar_prefetch=0,
                grid=(B_pad // TB,),
                in_specs=in_specs,
                out_specs=pl.BlockSpec((TB, H_pad), lambda i: (i, 0)),
                scratch_shapes=scratch_shapes,
            ),
            compiler_params=pltpu.CompilerParams(
                dimension_semantics=("parallel",),  # megacore-shard the batch axis
                vmem_limit_bytes=vmem_limit,
            ),
        )(*args)

    try:
        out = build_and_call(single_buffer=True)
    except Exception:
        # pl.Buffered(1) rejected by this jax/Mosaic version: fall back to default
        # double-buffering (same math, just more resident VMEM).
        out = build_and_call(single_buffer=False)

    return out[:B, :H]


def make_params(key, obs_dim, hidden, layer_N, use_relu=True):
    # Deterministic synthetic init mimicking the module's __init__:
    # orthogonal weights with gain=sqrt(2) (relu) / 5/3 (tanh), zero biases, LN gamma=1 beta=0.
    gain = jnp.sqrt(2.0) if use_relu else (5.0 / 3.0)
    ortho = jax.nn.initializers.orthogonal(scale=float(gain))
    k1, k2 = jax.random.split(key)
    w1 = ortho(k1, (obs_dim, hidden), jnp.float32)
    if layer_N > 0:
        w2_keys = jax.random.split(k2, layer_N)
        w2 = jnp.stack([ortho(w2_keys[i], (hidden, hidden), jnp.float32)
                        for i in range(layer_N)])
    else:
        w2 = jnp.zeros((0, hidden, hidden), jnp.float32)
    return {
        "fn_g": jnp.ones((1, obs_dim), jnp.float32),
        "fn_b": jnp.zeros((1, obs_dim), jnp.float32),
        "w1": w1,
        "b1": jnp.zeros((1, hidden), jnp.float32),
        "g1": jnp.ones((1, hidden), jnp.float32),
        "be1": jnp.zeros((1, hidden), jnp.float32),
        "w2": w2,
        "b2": jnp.zeros((layer_N, 1, hidden), jnp.float32),
        "g2": jnp.ones((layer_N, 1, hidden), jnp.float32),
        "be2": jnp.zeros((layer_N, 1, hidden), jnp.float32),
    }


def reference_forward(x, params, *, layer_N, use_relu=True, use_feature_norm=True):
    act = (lambda v: jnp.maximum(v, 0.0)) if use_relu else jnp.tanh
    h = x
    if use_feature_norm:
        h = _layernorm(h, params["fn_g"], params["fn_b"], h.shape[-1])
    h = act(h @ params["w1"] + params["b1"])
    h = _layernorm(h, params["g1"], params["be1"], h.shape[-1])
    for i in range(layer_N):
        h = act(h @ params["w2"][i] + params["b2"][i])
        h = _layernorm(h, params["g2"][i], params["be2"][i], h.shape[-1])
    return h


if __name__ == "__main__":
    # Small shapes consistent with the module's forward: x is [batch, obs_dim].
    batch, obs_dim, hidden, layer_N = 8, 20, 64, 2
    use_relu, use_feature_norm = True, True

    key = jax.random.PRNGKey(0)
    kx, kp = jax.random.split(key)
    x = jax.random.normal(kx, (batch, obs_dim), jnp.float32)
    params = make_params(kp, obs_dim, hidden, layer_N, use_relu=use_relu)

    ref = reference_forward(x, params, layer_N=layer_N,
                            use_relu=use_relu, use_feature_norm=use_feature_norm)

    # 1) Exact-semantics validation path: f32 matmul operands, resident w2.
    prep_f32 = prepare_params(params, layer_N=layer_N, use_feature_norm=use_feature_norm,
                              matmul_dtype=jnp.float32)
    out_f32 = jax.block_until_ready(mlp_base_forward(x, prep_f32, use_relu=use_relu))
    assert out_f32.shape == (batch, hidden)
    assert bool(jnp.allclose(out_f32, ref, atol=2e-4, rtol=2e-4))

    # 2) Optimized path (default): bf16 input / bf16 MXU operands, f32 LN math, resident w2.
    prep_bf16 = prepare_params(params, layer_N=layer_N, use_feature_norm=use_feature_norm,
                               matmul_dtype=jnp.bfloat16)
    out_bf16 = jax.block_until_ready(mlp_base_forward(x, prep_bf16, use_relu=use_relu))
    assert out_bf16.shape == (batch, hidden)
    assert bool(jnp.allclose(out_bf16, ref, atol=5e-2, rtol=5e-2))

    # 3) Deep-stack path: w2 streamed from HBM via manual double-buffered DMA (forced here to
    #    validate the path; it is auto-selected when the stack would not fit in VMEM).
    out_stream = jax.block_until_ready(
        mlp_base_forward(x, prep_bf16, use_relu=use_relu, w2_resident=False))
    assert out_stream.shape == (batch, hidden)
    assert bool(jnp.allclose(out_stream, ref, atol=5e-2, rtol=5e-2))

    print("KERNEL_OK")
</pallas_src>

<mosaic_0001>
module attributes {stable_mosaic.version = 11 : i64} {
  func.func @mlp_base_kernel(%arg0: i32, %arg1: memref<8x128xf32, #tpu.memory_space<vmem>>, %arg2: memref<1x128xf32, #tpu.memory_space<vmem>>, %arg3: memref<1x128xf32, #tpu.memory_space<vmem>>, %arg4: memref<128x128xf32, #tpu.memory_space<vmem>>, %arg5: memref<1x128xf32, #tpu.memory_space<vmem>>, %arg6: memref<1x128xf32, #tpu.memory_space<vmem>>, %arg7: memref<1x128xf32, #tpu.memory_space<vmem>>, %arg8: memref<2x128x128xf32, #tpu.memory_space<vmem>>, %arg9: memref<2x1x128xf32, #tpu.memory_space<vmem>>, %arg10: memref<2x1x128xf32, #tpu.memory_space<vmem>>, %arg11: memref<2x1x128xf32, #tpu.memory_space<vmem>>, %arg12: memref<8x128xf32, #tpu.memory_space<vmem>>) attributes {dimension_semantics = [#tpu.dimension_semantics<parallel>], iteration_bounds = array<i64: 1>, scalar_prefetch = 0 : i64, scratch_operands = 0 : i64, tpu.core_type = #tpu.core_type<tc>, window_params = [{transform_indices = @transform_0, window_bounds = array<i64: 8, 128>}, {pipeline_mode = #tpu.pipeline_mode<synchronous>, transform_indices = @transform_1, window_bounds = array<i64: 1, 128>}, {pipeline_mode = #tpu.pipeline_mode<synchronous>, transform_indices = @transform_2, window_bounds = array<i64: 1, 128>}, {pipeline_mode = #tpu.pipeline_mode<synchronous>, transform_indices = @transform_3, window_bounds = array<i64: 128, 128>}, {pipeline_mode = #tpu.pipeline_mode<synchronous>, transform_indices = @transform_4, window_bounds = array<i64: 1, 128>}, {pipeline_mode = #tpu.pipeline_mode<synchronous>, transform_indices = @transform_5, window_bounds = array<i64: 1, 128>}, {pipeline_mode = #tpu.pipeline_mode<synchronous>, transform_indices = @transform_6, window_bounds = array<i64: 1, 128>}, {pipeline_mode = #tpu.pipeline_mode<synchronous>, transform_indices = @transform_7, window_bounds = array<i64: 2, 128, 128>}, {pipeline_mode = #tpu.pipeline_mode<synchronous>, transform_indices = @transform_8, window_bounds = array<i64: 2, 1, 128>}, {pipeline_mode = #tpu.pipeline_mode<synchronous>, transform_indices = @transform_9, window_bounds = array<i64: 2, 1, 128>}, {pipeline_mode = #tpu.pipeline_mode<synchronous>, transform_indices = @transform_10, window_bounds = array<i64: 2, 1, 128>}, {transform_indices = @transform_11, window_bounds = array<i64: 8, 128>}]} {
    %c0 = arith.constant 0 : index
    %c0_0 = arith.constant 0 : index
    %0 = vector.load %arg1[%c0, %c0_0] : memref<8x128xf32, #tpu.memory_space<vmem>>, vector<8x128xf32>
    %c0_1 = arith.constant 0 : index
    %c0_2 = arith.constant 0 : index
    %1 = vector.load %arg2[%c0_1, %c0_2] : memref<1x128xf32, #tpu.memory_space<vmem>>, vector<1x128xf32>
    %c0_3 = arith.constant 0 : index
    %c0_4 = arith.constant 0 : index
    %2 = vector.load %arg3[%c0_3, %c0_4] : memref<1x128xf32, #tpu.memory_space<vmem>>, vector<1x128xf32>
    %cst = arith.constant dense<0.000000e+00> : vector<8xf32>
    %3 = vector.multi_reduction <add>, %0, %cst [1] : vector<8x128xf32> to vector<8xf32>
    %4 = vector.shape_cast %3 : vector<8xf32> to vector<8x1xf32>
    %cst_5 = arith.constant 5.000000e-02 : f32
    %5 = vector.broadcast %cst_5 : f32 to vector<8x1xf32>
    %6 = arith.mulf %4, %5 : vector<8x1xf32>
    %7 = vector.broadcast %6 : vector<8x1xf32> to vector<8x128xf32>
    %8 = arith.subf %0, %7 : vector<8x128xf32>
    %9 = tpu.iota {dimensions = array<i32: 1>} : vector<8x128xi32>
    %c20_i32 = arith.constant 20 : i32
    %10 = vector.broadcast %c20_i32 : i32 to vector<8x128xi32>
    %11 = arith.cmpi slt, %9, %10 : vector<8x128xi32>
    %cst_6 = arith.constant 0.000000e+00 : f32
    %12 = vector.broadcast %cst_6 : f32 to vector<8x128xf32>
    %13 = arith.select %11, %8, %12 : vector<8x128xi1>, vector<8x128xf32>
    %14 = arith.mulf %13, %13 : vector<8x128xf32>
    %cst_7 = arith.constant dense<0.000000e+00> : vector<8xf32>
    %15 = vector.multi_reduction <add>, %14, %cst_7 [1] : vector<8x128xf32> to vector<8xf32>
    %16 = vector.shape_cast %15 : vector<8xf32> to vector<8x1xf32>
    %cst_8 = arith.constant 5.000000e-02 : f32
    %17 = vector.broadcast %cst_8 : f32 to vector<8x1xf32>
    %18 = arith.mulf %16, %17 : vector<8x1xf32>
    %cst_9 = arith.constant 9.99999974E-6 : f32
    %19 = vector.broadcast %cst_9 : f32 to vector<8x1xf32>
    %20 = arith.addf %18, %19 : vector<8x1xf32>
    %21 = math.rsqrt %20 : vector<8x1xf32>
    %22 = vector.broadcast %21 : vector<8x1xf32> to vector<8x128xf32>
    %23 = arith.mulf %13, %22 : vector<8x128xf32>
    %24 = vector.broadcast %1 : vector<1x128xf32> to vector<8x128xf32>
    %25 = arith.mulf %23, %24 : vector<8x128xf32>
    %26 = vector.broadcast %2 : vector<1x128xf32> to vector<8x128xf32>
    %27 = arith.addf %25, %26 : vector<8x128xf32>
    %c0_10 = arith.constant 0 : index
    %c0_11 = arith.constant 0 : index
    %28 = vector.load %arg4[%c0_10, %c0_11] : memref<128x128xf32, #tpu.memory_space<vmem>>, vector<128x128xf32>
    %cst_12 = arith.constant dense<0.000000e+00> : vector<8x128xf32>
    %29 = tpu.matmul %27, %28, %cst_12 {dimension_numbers = #tpu.dot_dimension_numbers<[1], [0], [0], [1], [0, 0, 1, 1], [], []>} : vector<8x128xf32>, vector<128x128xf32>, vector<8x128xf32> -> vector<8x128xf32>
    %c0_13 = arith.constant 0 : index
    %c0_14 = arith.constant 0 : index
    %30 = vector.load %arg5[%c0_13, %c0_14] : memref<1x128xf32, #tpu.memory_space<vmem>>, vector<1x128xf32>
    %31 = vector.broadcast %30 : vector<1x128xf32> to vector<8x128xf32>
    %32 = arith.addf %29, %31 : vector<8x128xf32>
    %cst_15 = arith.constant 0.000000e+00 : f32
    %33 = vector.broadcast %cst_15 : f32 to vector<8x128xf32>
    %34 = arith.maximumf %32, %33 : vector<8x128xf32>
    %c0_16 = arith.constant 0 : index
    %c0_17 = arith.constant 0 : index
    %35 = vector.load %arg6[%c0_16, %c0_17] : memref<1x128xf32, #tpu.memory_space<vmem>>, vector<1x128xf32>
    %c0_18 = arith.constant 0 : index
    %c0_19 = arith.constant 0 : index
    %36 = vector.load %arg7[%c0_18, %c0_19] : memref<1x128xf32, #tpu.memory_space<vmem>>, vector<1x128xf32>
    %cst_20 = arith.constant dense<0.000000e+00> : vector<8xf32>
    %37 = vector.multi_reduction <add>, %34, %cst_20 [1] : vector<8x128xf32> to vector<8xf32>
    %38 = vector.shape_cast %37 : vector<8xf32> to vector<8x1xf32>
    %39 = arith.mulf %34, %34 : vector<8x128xf32>
    %cst_21 = arith.constant dense<0.000000e+00> : vector<8xf32>
    %40 = vector.multi_reduction <add>, %39, %cst_21 [1] : vector<8x128xf32> to vector<8xf32>
    %41 = vector.shape_cast %40 : vector<8xf32> to vector<8x1xf32>
    %cst_22 = arith.constant 1.562500e-02 : f32
    %42 = vector.broadcast %cst_22 : f32 to vector<8x1xf32>
    %43 = arith.mulf %38, %42 : vector<8x1xf32>
    %cst_23 = arith.constant 1.562500e-02 : f32
    %44 = vector.broadcast %cst_23 : f32 to vector<8x1xf32>
    %45 = arith.mulf %41, %44 : vector<8x1xf32>
    %46 = arith.mulf %43, %43 : vector<8x1xf32>
    %47 = arith.subf %45, %46 : vector<8x1xf32>
    %cst_24 = arith.constant 9.99999974E-6 : f32
    %48 = vector.broadcast %cst_24 : f32 to vector<8x1xf32>
    %49 = arith.addf %47, %48 : vector<8x1xf32>
    %50 = math.rsqrt %49 : vector<8x1xf32>
    %51 = vector.broadcast %43 : vector<8x1xf32> to vector<8x128xf32>
    %52 = arith.subf %34, %51 : vector<8x128xf32>
    %53 = vector.broadcast %50 : vector<8x1xf32> to vector<8x128xf32>
    %54 = arith.mulf %52, %53 : vector<8x128xf32>
    %55 = vector.broadcast %35 : vector<1x128xf32> to vector<8x128xf32>
    %56 = arith.mulf %54, %55 : vector<8x128xf32>
    %57 = vector.broadcast %36 : vector<1x128xf32> to vector<8x128xf32>
    %58 = arith.addf %56, %57 : vector<8x128xf32>
    %c0_25 = arith.constant 0 : index
    %c0_26 = arith.constant 0 : index
    %c0_27 = arith.constant 0 : index
    %59 = vector.load %arg8[%c0_25, %c0_26, %c0_27] : memref<2x128x128xf32, #tpu.memory_space<vmem>>, vector<1x128x128xf32>
    %60 = vector.shape_cast %59 : vector<1x128x128xf32> to vector<128x128xf32>
    %cst_28 = arith.constant dense<0.000000e+00> : vector<8x128xf32>
    %61 = tpu.matmul %58, %60, %cst_28 {dimension_numbers = #tpu.dot_dimension_numbers<[1], [0], [0], [1], [0, 0, 1, 1], [], []>} : vector<8x128xf32>, vector<128x128xf32>, vector<8x128xf32> -> vector<8x128xf32>
    %c0_29 = arith.constant 0 : index
    %c0_30 = arith.constant 0 : index
    %c0_31 = arith.constant 0 : index
    %62 = vector.load %arg9[%c0_29, %c0_30, %c0_31] : memref<2x1x128xf32, #tpu.memory_space<vmem>>, vector<1x1x128xf32>
    %63 = vector.shape_cast %62 : vector<1x1x128xf32> to vector<1x128xf32>
    %64 = vector.broadcast %63 : vector<1x128xf32> to vector<8x128xf32>
    %65 = arith.addf %61, %64 : vector<8x128xf32>
    %cst_32 = arith.constant 0.000000e+00 : f32
    %66 = vector.broadcast %cst_32 : f32 to vector<8x128xf32>
    %67 = arith.maximumf %65, %66 : vector<8x128xf32>
    %c0_33 = arith.constant 0 : index
    %c0_34 = arith.constant 0 : index
    %c0_35 = arith.constant 0 : index
    %68 = vector.load %arg10[%c0_33, %c0_34, %c0_35] : memref<2x1x128xf32, #tpu.memory_space<vmem>>, vector<1x1x128xf32>
    %69 = vector.shape_cast %68 : vector<1x1x128xf32> to vector<1x128xf32>
    %c0_36 = arith.constant 0 : index
    %c0_37 = arith.constant 0 : index
    %c0_38 = arith.constant 0 : index
    %70 = vector.load %arg11[%c0_36, %c0_37, %c0_38] : memref<2x1x128xf32, #tpu.memory_space<vmem>>, vector<1x1x128xf32>
    %71 = vector.shape_cast %70 : vector<1x1x128xf32> to vector<1x128xf32>
    %cst_39 = arith.constant dense<0.000000e+00> : vector<8xf32>
    %72 = vector.multi_reduction <add>, %67, %cst_39 [1] : vector<8x128xf32> to vector<8xf32>
    %73 = vector.shape_cast %72 : vector<8xf32> to vector<8x1xf32>
    %74 = arith.mulf %67, %67 : vector<8x128xf32>
    %cst_40 = arith.constant dense<0.000000e+00> : vector<8xf32>
    %75 = vector.multi_reduction <add>, %74, %cst_40 [1] : vector<8x128xf32> to vector<8xf32>
    %76 = vector.shape_cast %75 : vector<8xf32> to vector<8x1xf32>
    %cst_41 = arith.constant 1.562500e-02 : f32
    %77 = vector.broadcast %cst_41 : f32 to vector<8x1xf32>
    %78 = arith.mulf %73, %77 : vector<8x1xf32>
    %cst_42 = arith.constant 1.562500e-02 : f32
    %79 = vector.broadcast %cst_42 : f32 to vector<8x1xf32>
    %80 = arith.mulf %76, %79 : vector<8x1xf32>
    %81 = arith.mulf %78, %78 : vector<8x1xf32>
    %82 = arith.subf %80, %81 : vector<8x1xf32>
    %cst_43 = arith.constant 9.99999974E-6 : f32
    %83 = vector.broadcast %cst_43 : f32 to vector<8x1xf32>
    %84 = arith.addf %82, %83 : vector<8x1xf32>
    %85 = math.rsqrt %84 : vector<8x1xf32>
    %86 = vector.broadcast %78 : vector<8x1xf32> to vector<8x128xf32>
    %87 = arith.subf %67, %86 : vector<8x128xf32>
    %88 = vector.broadcast %85 : vector<8x1xf32> to vector<8x128xf32>
    %89 = arith.mulf %87, %88 : vector<8x128xf32>
    %90 = vector.broadcast %69 : vector<1x128xf32> to vector<8x128xf32>
    %91 = arith.mulf %89, %90 : vector<8x128xf32>
    %92 = vector.broadcast %71 : vector<1x128xf32> to vector<8x128xf32>
    %93 = arith.addf %91, %92 : vector<8x128xf32>
    %c1 = arith.constant 1 : index
    %c0_44 = arith.constant 0 : index
    %c0_45 = arith.constant 0 : index
    %94 = vector.load %arg8[%c1, %c0_44, %c0_45] : memref<2x128x128xf32, #tpu.memory_space<vmem>>, vector<1x128x128xf32>
    %95 = vector.shape_cast %94 : vector<1x128x128xf32> to vector<128x128xf32>
    %cst_46 = arith.constant dense<0.000000e+00> : vector<8x128xf32>
    %96 = tpu.matmul %93, %95, %cst_46 {dimension_numbers = #tpu.dot_dimension_numbers<[1], [0], [0], [1], [0, 0, 1, 1], [], []>} : vector<8x128xf32>, vector<128x128xf32>, vector<8x128xf32> -> vector<8x128xf32>
    %c1_47 = arith.constant 1 : index
    %c0_48 = arith.constant 0 : index
    %c0_49 = arith.constant 0 : index
    %97 = vector.load %arg9[%c1_47, %c0_48, %c0_49] : memref<2x1x128xf32, #tpu.memory_space<vmem>>, vector<1x1x128xf32>
    %98 = vector.shape_cast %97 : vector<1x1x128xf32> to vector<1x128xf32>
    %99 = vector.broadcast %98 : vector<1x128xf32> to vector<8x128xf32>
    %100 = arith.addf %96, %99 : vector<8x128xf32>
    %cst_50 = arith.constant 0.000000e+00 : f32
    %101 = vector.broadcast %cst_50 : f32 to vector<8x128xf32>
    %102 = arith.maximumf %100, %101 : vector<8x128xf32>
    %c1_51 = arith.constant 1 : index
    %c0_52 = arith.constant 0 : index
    %c0_53 = arith.constant 0 : index
    %103 = vector.load %arg10[%c1_51, %c0_52, %c0_53] : memref<2x1x128xf32, #tpu.memory_space<vmem>>, vector<1x1x128xf32>
    %104 = vector.shape_cast %103 : vector<1x1x128xf32> to vector<1x128xf32>
    %c1_54 = arith.constant 1 : index
    %c0_55 = arith.constant 0 : index
    %c0_56 = arith.constant 0 : index
    %105 = vector.load %arg11[%c1_54, %c0_55, %c0_56] : memref<2x1x128xf32, #tpu.memory_space<vmem>>, vector<1x1x128xf32>
    %106 = vector.shape_cast %105 : vector<1x1x128xf32> to vector<1x128xf32>
    %cst_57 = arith.constant dense<0.000000e+00> : vector<8xf32>
    %107 = vector.multi_reduction <add>, %102, %cst_57 [1] : vector<8x128xf32> to vector<8xf32>
    %108 = vector.shape_cast %107 : vector<8xf32> to vector<8x1xf32>
    %109 = arith.mulf %102, %102 : vector<8x128xf32>
    %cst_58 = arith.constant dense<0.000000e+00> : vector<8xf32>
    %110 = vector.multi_reduction <add>, %109, %cst_58 [1] : vector<8x128xf32> to vector<8xf32>
    %111 = vector.shape_cast %110 : vector<8xf32> to vector<8x1xf32>
    %cst_59 = arith.constant 1.562500e-02 : f32
    %112 = vector.broadcast %cst_59 : f32 to vector<8x1xf32>
    %113 = arith.mulf %108, %112 : vector<8x1xf32>
    %cst_60 = arith.constant 1.562500e-02 : f32
    %114 = vector.broadcast %cst_60 : f32 to vector<8x1xf32>
    %115 = arith.mulf %111, %114 : vector<8x1xf32>
    %116 = arith.mulf %113, %113 : vector<8x1xf32>
    %117 = arith.subf %115, %116 : vector<8x1xf32>
    %cst_61 = arith.constant 9.99999974E-6 : f32
    %118 = vector.broadcast %cst_61 : f32 to vector<8x1xf32>
    %119 = arith.addf %117, %118 : vector<8x1xf32>
    %120 = math.rsqrt %119 : vector<8x1xf32>
    %121 = vector.broadcast %113 : vector<8x1xf32> to vector<8x128xf32>
    %122 = arith.subf %102, %121 : vector<8x128xf32>
    %123 = vector.broadcast %120 : vector<8x1xf32> to vector<8x128xf32>
    %124 = arith.mulf %122, %123 : vector<8x128xf32>
    %125 = vector.broadcast %104 : vector<1x128xf32> to vector<8x128xf32>
    %126 = arith.mulf %124, %125 : vector<8x128xf32>
    %127 = vector.broadcast %106 : vector<1x128xf32> to vector<8x128xf32>
    %128 = arith.addf %126, %127 : vector<8x128xf32>
    %c0_62 = arith.constant 0 : index
    %c0_63 = arith.constant 0 : index
    %129 = vector.load %arg12[%c0_62, %c0_63] : memref<8x128xf32, #tpu.memory_space<vmem>>, vector<8x128xf32>
    tpu.vector_store %arg12[%c0_62, %c0_63], %128 {strides = array<i32>} : memref<8x128xf32, #tpu.memory_space<vmem>>, vector<8x128xf32>,
    return
  }
  func.func @transform_0(%arg0: i32) -> (i32, i32) {
    %c0_i32 = arith.constant 0 : i32
    %c0_i32_0 = arith.constant 0 : i32
    return %arg0, %c0_i32 : i32, i32
  }
  func.func @transform_1(%arg0: i32) -> (i32, i32) {
    %c0_i32 = arith.constant 0 : i32
    %c0_i32_0 = arith.constant 0 : i32
    %c0_i32_1 = arith.constant 0 : i32
    return %c0_i32, %c0_i32_0 : i32, i32
  }
  func.func @transform_2(%arg0: i32) -> (i32, i32) {
    %c0_i32 = arith.constant 0 : i32
    %c0_i32_0 = arith.constant 0 : i32
    %c0_i32_1 = arith.constant 0 : i32
    return %c0_i32, %c0_i32_0 : i32, i32
  }
  func.func @transform_3(%arg0: i32) -> (i32, i32) {
    %c0_i32 = arith.constant 0 : i32
    %c0_i32_0 = arith.constant 0 : i32
    %c0_i32_1 = arith.constant 0 : i32
    return %c0_i32, %c0_i32_0 : i32, i32
  }
  func.func @transform_4(%arg0: i32) -> (i32, i32) {
    %c0_i32 = arith.constant 0 : i32
    %c0_i32_0 = arith.constant 0 : i32
    %c0_i32_1 = arith.constant 0 : i32
    return %c0_i32, %c0_i32_0 : i32, i32
  }
  func.func @transform_5(%arg0: i32) -> (i32, i32) {
    %c0_i32 = arith.constant 0 : i32
    %c0_i32_0 = arith.constant 0 : i32
    %c0_i32_1 = arith.constant 0 : i32
    return %c0_i32, %c0_i32_0 : i32, i32
  }
  func.func @transform_6(%arg0: i32) -> (i32, i32) {
    %c0_i32 = arith.constant 0 : i32
    %c0_i32_0 = arith.constant 0 : i32
    %c0_i32_1 = arith.constant 0 : i32
    return %c0_i32, %c0_i32_0 : i32, i32
  }
  func.func @transform_7(%arg0: i32) -> (i32, i32, i32) {
    %c0_i32 = arith.constant 0 : i32
    %c0_i32_0 = arith.constant 0 : i32
    %c0_i32_1 = arith.constant 0 : i32
    %c0_i32_2 = arith.constant 0 : i32
    return %c0_i32, %c0_i32_0, %c0_i32_1 : i32, i32, i32
  }
  func.func @transform_8(%arg0: i32) -> (i32, i32, i32) {
    %c0_i32 = arith.constant 0 : i32
    %c0_i32_0 = arith.constant 0 : i32
    %c0_i32_1 = arith.constant 0 : i32
    %c0_i32_2 = arith.constant 0 : i32
    return %c0_i32, %c0_i32_0, %c0_i32_1 : i32, i32, i32
  }
  func.func @transform_9(%arg0: i32) -> (i32, i32, i32) {
    %c0_i32 = arith.constant 0 : i32
    %c0_i32_0 = arith.constant 0 : i32
    %c0_i32_1 = arith.constant 0 : i32
    %c0_i32_2 = arith.constant 0 : i32
    return %c0_i32, %c0_i32_0, %c0_i32_1 : i32, i32, i32
  }
  func.func @transform_10(%arg0: i32) -> (i32, i32, i32) {
    %c0_i32 = arith.constant 0 : i32
    %c0_i32_0 = arith.constant 0 : i32
    %c0_i32_1 = arith.constant 0 : i32
    %c0_i32_2 = arith.constant 0 : i32
    return %c0_i32, %c0_i32_0, %c0_i32_1 : i32, i32, i32
  }
  func.func @transform_11(%arg0: i32) -> (i32, i32) {
    %c0_i32 = arith.constant 0 : i32
    %c0_i32_0 = arith.constant 0 : i32
    return %arg0, %c0_i32 : i32, i32
  }
}

module attributes {stable_mosaic.version = 11 : i64} {
  func.func @mlp_base_kernel(%arg0: i32, %arg1: memref<8x128xf32, #tpu.memory_space<vmem>>, %arg2: memref<1x128xf32, #tpu.memory_space<vmem>>, %arg3: memref<1x128xf32, #tpu.memory_space<vmem>>, %arg4: memref<128x128xf32, #tpu.memory_space<vmem>>, %arg5: memref<1x128xf32, #tpu.memory_space<vmem>>, %arg6: memref<1x128xf32, #tpu.memory_space<vmem>>, %arg7: memref<1x128xf32, #tpu.memory_space<vmem>>, %arg8: memref<2x128x128xf32, #tpu.memory_space<vmem>>, %arg9: memref<2x1x128xf32, #tpu.memory_space<vmem>>, %arg10: memref<2x1x128xf32, #tpu.memory_space<vmem>>, %arg11: memref<2x1x128xf32, #tpu.memory_space<vmem>>, %arg12: memref<8x128xf32, #tpu.memory_space<vmem>>) attributes {dimension_semantics = [#tpu.dimension_semantics<parallel>], iteration_bounds = array<i64: 1>, scalar_prefetch = 0 : i64, scratch_operands = 0 : i64, tpu.core_type = #tpu.core_type<tc>, window_params = [{transform_indices = @transform_0, window_bounds = array<i64: 8, 128>}, {pipeline_mode = #tpu.pipeline_mode<synchronous>, transform_indices = @transform_1, window_bounds = array<i64: 1, 128>}, {pipeline_mode = #tpu.pipeline_mode<synchronous>, transform_indices = @transform_2, window_bounds = array<i64: 1, 128>}, {pipeline_mode = #tpu.pipeline_mode<synchronous>, transform_indices = @transform_3, window_bounds = array<i64: 128, 128>}, {pipeline_mode = #tpu.pipeline_mode<synchronous>, transform_indices = @transform_4, window_bounds = array<i64: 1, 128>}, {pipeline_mode = #tpu.pipeline_mode<synchronous>, transform_indices = @transform_5, window_bounds = array<i64: 1, 128>}, {pipeline_mode = #tpu.pipeline_mode<synchronous>, transform_indices = @transform_6, window_bounds = array<i64: 1, 128>}, {pipeline_mode = #tpu.pipeline_mode<synchronous>, transform_indices = @transform_7, window_bounds = array<i64: 2, 128, 128>}, {pipeline_mode = #tpu.pipeline_mode<synchronous>, transform_indices = @transform_8, window_bounds = array<i64: 2, 1, 128>}, {pipeline_mode = #tpu.pipeline_mode<synchronous>, transform_indices = @transform_9, window_bounds = array<i64: 2, 1, 128>}, {pipeline_mode = #tpu.pipeline_mode<synchronous>, transform_indices = @transform_10, window_bounds = array<i64: 2, 1, 128>}, {transform_indices = @transform_11, window_bounds = array<i64: 8, 128>}]} {
    %c0 = arith.constant 0 : index
    %c0_0 = arith.constant 0 : index
    %0 = vector.load %arg1[%c0, %c0_0] : memref<8x128xf32, #tpu.memory_space<vmem>>, vector<8x128xf32>
    %c0_1 = arith.constant 0 : index
    %c0_2 = arith.constant 0 : index
    %1 = vector.load %arg2[%c0_1, %c0_2] : memref<1x128xf32, #tpu.memory_space<vmem>>, vector<1x128xf32>
    %c0_3 = arith.constant 0 : index
    %c0_4 = arith.constant 0 : index
    %2 = vector.load %arg3[%c0_3, %c0_4] : memref<1x128xf32, #tpu.memory_space<vmem>>, vector<1x128xf32>
    %cst = arith.constant dense<0.000000e+00> : vector<8xf32>
    %3 = vector.multi_reduction <add>, %0, %cst [1] : vector<8x128xf32> to vector<8xf32>
    %4 = vector.shape_cast %3 : vector<8xf32> to vector<8x1xf32>
    %cst_5 = arith.constant 5.000000e-02 : f32
    %5 = vector.broadcast %cst_5 : f32 to vector<8x1xf32>
    %6 = arith.mulf %4, %5 : vector<8x1xf32>
    %7 = vector.broadcast %6 : vector<8x1xf32> to vector<8x128xf32>
    %8 = arith.subf %0, %7 : vector<8x128xf32>
    %9 = tpu.iota {dimensions = array<i32: 1>} : vector<8x128xi32>
    %c20_i32 = arith.constant 20 : i32
    %10 = vector.broadcast %c20_i32 : i32 to vector<8x128xi32>
    %11 = arith.cmpi slt, %9, %10 : vector<8x128xi32>
    %cst_6 = arith.constant 0.000000e+00 : f32
    %12 = vector.broadcast %cst_6 : f32 to vector<8x128xf32>
    %13 = arith.select %11, %8, %12 : vector<8x128xi1>, vector<8x128xf32>
    %14 = arith.mulf %13, %13 : vector<8x128xf32>
    %cst_7 = arith.constant dense<0.000000e+00> : vector<8xf32>
    %15 = vector.multi_reduction <add>, %14, %cst_7 [1] : vector<8x128xf32> to vector<8xf32>
    %16 = vector.shape_cast %15 : vector<8xf32> to vector<8x1xf32>
    %cst_8 = arith.constant 5.000000e-02 : f32
    %17 = vector.broadcast %cst_8 : f32 to vector<8x1xf32>
    %18 = arith.mulf %16, %17 : vector<8x1xf32>
    %cst_9 = arith.constant 9.99999974E-6 : f32
    %19 = vector.broadcast %cst_9 : f32 to vector<8x1xf32>
    %20 = arith.addf %18, %19 : vector<8x1xf32>
    %21 = math.rsqrt %20 : vector<8x1xf32>
    %22 = vector.broadcast %21 : vector<8x1xf32> to vector<8x128xf32>
    %23 = arith.mulf %13, %22 : vector<8x128xf32>
    %24 = vector.broadcast %1 : vector<1x128xf32> to vector<8x128xf32>
    %25 = arith.mulf %23, %24 : vector<8x128xf32>
    %26 = vector.broadcast %2 : vector<1x128xf32> to vector<8x128xf32>
    %27 = arith.addf %25, %26 : vector<8x128xf32>
    %c0_10 = arith.constant 0 : index
    %c0_11 = arith.constant 0 : index
    %28 = vector.load %arg4[%c0_10, %c0_11] : memref<128x128xf32, #tpu.memory_space<vmem>>, vector<128x128xf32>
    %cst_12 = arith.constant dense<0.000000e+00> : vector<8x128xf32>
    %29 = tpu.matmul %27, %28, %cst_12 {dimension_numbers = #tpu.dot_dimension_numbers<[1], [0], [0], [1], [0, 0, 1, 1], [], []>} : vector<8x128xf32>, vector<128x128xf32>, vector<8x128xf32> -> vector<8x128xf32>
    %c0_13 = arith.constant 0 : index
    %c0_14 = arith.constant 0 : index
    %30 = vector.load %arg5[%c0_13, %c0_14] : memref<1x128xf32, #tpu.memory_space<vmem>>, vector<1x128xf32>
    %31 = vector.broadcast %30 : vector<1x128xf32> to vector<8x128xf32>
    %32 = arith.addf %29, %31 : vector<8x128xf32>
    %cst_15 = arith.constant 0.000000e+00 : f32
    %33 = vector.broadcast %cst_15 : f32 to vector<8x128xf32>
    %34 = arith.maximumf %32, %33 : vector<8x128xf32>
    %c0_16 = arith.constant 0 : index
    %c0_17 = arith.constant 0 : index
    %35 = vector.load %arg6[%c0_16, %c0_17] : memref<1x128xf32, #tpu.memory_space<vmem>>, vector<1x128xf32>
    %c0_18 = arith.constant 0 : index
    %c0_19 = arith.constant 0 : index
    %36 = vector.load %arg7[%c0_18, %c0_19] : memref<1x128xf32, #tpu.memory_space<vmem>>, vector<1x128xf32>
    %cst_20 = arith.constant dense<0.000000e+00> : vector<8xf32>
    %37 = vector.multi_reduction <add>, %34, %cst_20 [1] : vector<8x128xf32> to vector<8xf32>
    %38 = vector.shape_cast %37 : vector<8xf32> to vector<8x1xf32>
    %39 = arith.mulf %34, %34 : vector<8x128xf32>
    %cst_21 = arith.constant dense<0.000000e+00> : vector<8xf32>
    %40 = vector.multi_reduction <add>, %39, %cst_21 [1] : vector<8x128xf32> to vector<8xf32>
    %41 = vector.shape_cast %40 : vector<8xf32> to vector<8x1xf32>
    %cst_22 = arith.constant 1.562500e-02 : f32
    %42 = vector.broadcast %cst_22 : f32 to vector<8x1xf32>
    %43 = arith.mulf %38, %42 : vector<8x1xf32>
    %cst_23 = arith.constant 1.562500e-02 : f32
    %44 = vector.broadcast %cst_23 : f32 to vector<8x1xf32>
    %45 = arith.mulf %41, %44 : vector<8x1xf32>
    %46 = arith.mulf %43, %43 : vector<8x1xf32>
    %47 = arith.subf %45, %46 : vector<8x1xf32>
    %cst_24 = arith.constant 9.99999974E-6 : f32
    %48 = vector.broadcast %cst_24 : f32 to vector<8x1xf32>
    %49 = arith.addf %47, %48 : vector<8x1xf32>
    %50 = math.rsqrt %49 : vector<8x1xf32>
    %51 = vector.broadcast %43 : vector<8x1xf32> to vector<8x128xf32>
    %52 = arith.subf %34, %51 : vector<8x128xf32>
    %53 = vector.broadcast %50 : vector<8x1xf32> to vector<8x128xf32>
    %54 = arith.mulf %52, %53 : vector<8x128xf32>
    %55 = vector.broadcast %35 : vector<1x128xf32> to vector<8x128xf32>
    %56 = arith.mulf %54, %55 : vector<8x128xf32>
    %57 = vector.broadcast %36 : vector<1x128xf32> to vector<8x128xf32>
    %58 = arith.addf %56, %57 : vector<8x128xf32>
    %c0_25 = arith.constant 0 : index
    %c0_26 = arith.constant 0 : index
    %c0_27 = arith.constant 0 : index
    %59 = vector.load %arg8[%c0_25, %c0_26, %c0_27] : memref<2x128x128xf32, #tpu.memory_space<vmem>>, vector<1x128x128xf32>
    %60 = vector.shape_cast %59 : vector<1x128x128xf32> to vector<128x128xf32>
    %cst_28 = arith.constant dense<0.000000e+00> : vector<8x128xf32>
    %61 = tpu.matmul %58, %60, %cst_28 {dimension_numbers = #tpu.dot_dimension_numbers<[1], [0], [0], [1], [0, 0, 1, 1], [], []>} : vector<8x128xf32>, vector<128x128xf32>, vector<8x128xf32> -> vector<8x128xf32>
    %c0_29 = arith.constant 0 : index
    %c0_30 = arith.constant 0 : index
    %c0_31 = arith.constant 0 : index
    %62 = vector.load %arg9[%c0_29, %c0_30, %c0_31] : memref<2x1x128xf32, #tpu.memory_space<vmem>>, vector<1x1x128xf32>
    %63 = vector.shape_cast %62 : vector<1x1x128xf32> to vector<1x128xf32>
    %64 = vector.broadcast %63 : vector<1x128xf32> to vector<8x128xf32>
    %65 = arith.addf %61, %64 : vector<8x128xf32>
    %cst_32 = arith.constant 0.000000e+00 : f32
    %66 = vector.broadcast %cst_32 : f32 to vector<8x128xf32>
    %67 = arith.maximumf %65, %66 : vector<8x128xf32>
    %c0_33 = arith.constant 0 : index
    %c0_34 = arith.constant 0 : index
    %c0_35 = arith.constant 0 : index
    %68 = vector.load %arg10[%c0_33, %c0_34, %c0_35] : memref<2x1x128xf32, #tpu.memory_space<vmem>>, vector<1x1x128xf32>
    %69 = vector.shape_cast %68 : vector<1x1x128xf32> to vector<1x128xf32>
    %c0_36 = arith.constant 0 : index
    %c0_37 = arith.constant 0 : index
    %c0_38 = arith.constant 0 : index
    %70 = vector.load %arg11[%c0_36, %c0_37, %c0_38] : memref<2x1x128xf32, #tpu.memory_space<vmem>>, vector<1x1x128xf32>
    %71 = vector.shape_cast %70 : vector<1x1x128xf32> to vector<1x128xf32>
    %cst_39 = arith.constant dense<0.000000e+00> : vector<8xf32>
    %72 = vector.multi_reduction <add>, %67, %cst_39 [1] : vector<8x128xf32> to vector<8xf32>
    %73 = vector.shape_cast %72 : vector<8xf32> to vector<8x1xf32>
    %74 = arith.mulf %67, %67 : vector<8x128xf32>
    %cst_40 = arith.constant dense<0.000000e+00> : vector<8xf32>
    %75 = vector.multi_reduction <add>, %74, %cst_40 [1] : vector<8x128xf32> to vector<8xf32>
    %76 = vector.shape_cast %75 : vector<8xf32> to vector<8x1xf32>
    %cst_41 = arith.constant 1.562500e-02 : f32
    %77 = vector.broadcast %cst_41 : f32 to vector<8x1xf32>
    %78 = arith.mulf %73, %77 : vector<8x1xf32>
    %cst_42 = arith.constant 1.562500e-02 : f32
    %79 = vector.broadcast %cst_42 : f32 to vector<8x1xf32>
    %80 = arith.mulf %76, %79 : vector<8x1xf32>
    %81 = arith.mulf %78, %78 : vector<8x1xf32>
    %82 = arith.subf %80, %81 : vector<8x1xf32>
    %cst_43 = arith.constant 9.99999974E-6 : f32
    %83 = vector.broadcast %cst_43 : f32 to vector<8x1xf32>
    %84 = arith.addf %82, %83 : vector<8x1xf32>
    %85 = math.rsqrt %84 : vector<8x1xf32>
    %86 = vector.broadcast %78 : vector<8x1xf32> to vector<8x128xf32>
    %87 = arith.subf %67, %86 : vector<8x128xf32>
    %88 = vector.broadcast %85 : vector<8x1xf32> to vector<8x128xf32>
    %89 = arith.mulf %87, %88 : vector<8x128xf32>
    %90 = vector.broadcast %69 : vector<1x128xf32> to vector<8x128xf32>
    %91 = arith.mulf %89, %90 : vector<8x128xf32>
    %92 = vector.broadcast %71 : vector<1x128xf32> to vector<8x128xf32>
    %93 = arith.addf %91, %92 : vector<8x128xf32>
    %c1 = arith.constant 1 : index
    %c0_44 = arith.constant 0 : index
    %c0_45 = arith.constant 0 : index
    %94 = vector.load %arg8[%c1, %c0_44, %c0_45] : memref<2x128x128xf32, #tpu.memory_space<vmem>>, vector<1x128x128xf32>
    %95 = vector.shape_cast %94 : vector<1x128x128xf32> to vector<128x128xf32>
    %cst_46 = arith.constant dense<0.000000e+00> : vector<8x128xf32>
    %96 = tpu.matmul %93, %95, %cst_46 {dimension_numbers = #tpu.dot_dimension_numbers<[1], [0], [0], [1], [0, 0, 1, 1], [], []>} : vector<8x128xf32>, vector<128x128xf32>, vector<8x128xf32> -> vector<8x128xf32>
    %c1_47 = arith.constant 1 : index
    %c0_48 = arith.constant 0 : index
    %c0_49 = arith.constant 0 : index
    %97 = vector.load %arg9[%c1_47, %c0_48, %c0_49] : memref<2x1x128xf32, #tpu.memory_space<vmem>>, vector<1x1x128xf32>
    %98 = vector.shape_cast %97 : vector<1x1x128xf32> to vector<1x128xf32>
    %99 = vector.broadcast %98 : vector<1x128xf32> to vector<8x128xf32>
    %100 = arith.addf %96, %99 : vector<8x128xf32>
    %cst_50 = arith.constant 0.000000e+00 : f32
    %101 = vector.broadcast %cst_50 : f32 to vector<8x128xf32>
    %102 = arith.maximumf %100, %101 : vector<8x128xf32>
    %c1_51 = arith.constant 1 : index
    %c0_52 = arith.constant 0 : index
    %c0_53 = arith.constant 0 : index
    %103 = vector.load %arg10[%c1_51, %c0_52, %c0_53] : memref<2x1x128xf32, #tpu.memory_space<vmem>>, vector<1x1x128xf32>
    %104 = vector.shape_cast %103 : vector<1x1x128xf32> to vector<1x128xf32>
    %c1_54 = arith.constant 1 : index
    %c0_55 = arith.constant 0 : index
    %c0_56 = arith.constant 0 : index
    %105 = vector.load %arg11[%c1_54, %c0_55, %c0_56] : memref<2x1x128xf32, #tpu.memory_space<vmem>>, vector<1x1x128xf32>
    %106 = vector.shape_cast %105 : vector<1x1x128xf32> to vector<1x128xf32>
    %cst_57 = arith.constant dense<0.000000e+00> : vector<8xf32>
    %107 = vector.multi_reduction <add>, %102, %cst_57 [1] : vector<8x128xf32> to vector<8xf32>
    %108 = vector.shape_cast %107 : vector<8xf32> to vector<8x1xf32>
    %109 = arith.mulf %102, %102 : vector<8x128xf32>
    %cst_58 = arith.constant dense<0.000000e+00> : vector<8xf32>
    %110 = vector.multi_reduction <add>, %109, %cst_58 [1] : vector<8x128xf32> to vector<8xf32>
    %111 = vector.shape_cast %110 : vector<8xf32> to vector<8x1xf32>
    %cst_59 = arith.constant 1.562500e-02 : f32
    %112 = vector.broadcast %cst_59 : f32 to vector<8x1xf32>
    %113 = arith.mulf %108, %112 : vector<8x1xf32>
    %cst_60 = arith.constant 1.562500e-02 : f32
    %114 = vector.broadcast %cst_60 : f32 to vector<8x1xf32>
    %115 = arith.mulf %111, %114 : vector<8x1xf32>
    %116 = arith.mulf %113, %113 : vector<8x1xf32>
    %117 = arith.subf %115, %116 : vector<8x1xf32>
    %cst_61 = arith.constant 9.99999974E-6 : f32
    %118 = vector.broadcast %cst_61 : f32 to vector<8x1xf32>
    %119 = arith.addf %117, %118 : vector<8x1xf32>
    %120 = math.rsqrt %119 : vector<8x1xf32>
    %121 = vector.broadcast %113 : vector<8x1xf32> to vector<8x128xf32>
    %122 = arith.subf %102, %121 : vector<8x128xf32>
    %123 = vector.broadcast %120 : vector<8x1xf32> to vector<8x128xf32>
    %124 = arith.mulf %122, %123 : vector<8x128xf32>
    %125 = vector.broadcast %104 : vector<1x128xf32> to vector<8x128xf32>
    %126 = arith.mulf %124, %125 : vector<8x128xf32>
    %127 = vector.broadcast %106 : vector<1x128xf32> to vector<8x128xf32>
    %128 = arith.addf %126, %127 : vector<8x128xf32>
    %c0_62 = arith.constant 0 : index
    %c0_63 = arith.constant 0 : index
    %129 = vector.load %arg12[%c0_62, %c0_63] : memref<8x128xf32, #tpu.memory_space<vmem>>, vector<8x128xf32>
    tpu.vector_store %arg12[%c0_62, %c0_63], %128 {strides = array<i32>} : memref<8x128xf32, #tpu.memory_space<vmem>>, vector<8x128xf32>,
    return
  }
  func.func @transform_0(%arg0: i32) -> (i32, i32) {
    %c0_i32 = arith.constant 0 : i32
    %c0_i32_0 = arith.constant 0 : i32
    return %arg0, %c0_i32 : i32, i32
  }
  func.func @transform_1(%arg0: i32) -> (i32, i32) {
    %c0_i32 = arith.constant 0 : i32
    %c0_i32_0 = arith.constant 0 : i32
    %c0_i32_1 = arith.constant 0 : i32
    return %c0_i32, %c0_i32_0 : i32, i32
  }
  func.func @transform_2(%arg0: i32) -> (i32, i32) {
    %c0_i32 = arith.constant 0 : i32
    %c0_i32_0 = arith.constant 0 : i32
    %c0_i32_1 = arith.constant 0 : i32
    return %c0_i32, %c0_i32_0 : i32, i32
  }
  func.func @transform_3(%arg0: i32) -> (i32, i32) {
    %c0_i32 = arith.constant 0 : i32
    %c0_i32_0 = arith.constant 0 : i32
    %c0_i32_1 = arith.constant 0 : i32
    return %c0_i32, %c0_i32_0 : i32, i32
  }
  func.func @transform_4(%arg0: i32) -> (i32, i32) {
    %c0_i32 = arith.constant 0 : i32
    %c0_i32_0 = arith.constant 0 : i32
    %c0_i32_1 = arith.constant 0 : i32
    return %c0_i32, %c0_i32_0 : i32, i32
  }
  func.func @transform_5(%arg0: i32) -> (i32, i32) {
    %c0_i32 = arith.constant 0 : i32
    %c0_i32_0 = arith.constant 0 : i32
    %c0_i32_1 = arith.constant 0 : i32
    return %c0_i32, %c0_i32_0 : i32, i32
  }
  func.func @transform_6(%arg0: i32) -> (i32, i32) {
    %c0_i32 = arith.constant 0 : i32
    %c0_i32_0 = arith.constant 0 : i32
    %c0_i32_1 = arith.constant 0 : i32
    return %c0_i32, %c0_i32_0 : i32, i32
  }
  func.func @transform_7(%arg0: i32) -> (i32, i32, i32) {
    %c0_i32 = arith.constant 0 : i32
    %c0_i32_0 = arith.constant 0 : i32
    %c0_i32_1 = arith.constant 0 : i32
    %c0_i32_2 = arith.constant 0 : i32
    return %c0_i32, %c0_i32_0, %c0_i32_1 : i32, i32, i32
  }
  func.func @transform_8(%arg0: i32) -> (i32, i32, i32) {
    %c0_i32 = arith.constant 0 : i32
    %c0_i32_0 = arith.constant 0 : i32
    %c0_i32_1 = arith.constant 0 : i32
    %c0_i32_2 = arith.constant 0 : i32
    return %c0_i32, %c0_i32_0, %c0_i32_1 : i32, i32, i32
  }
  func.func @transform_9(%arg0: i32) -> (i32, i32, i32) {
    %c0_i32 = arith.constant 0 : i32
    %c0_i32_0 = arith.constant 0 : i32
    %c0_i32_1 = arith.constant 0 : i32
    %c0_i32_2 = arith.constant 0 : i32
    return %c0_i32, %c0_i32_0, %c0_i32_1 : i32, i32, i32
  }
  func.func @transform_10(%arg0: i32) -> (i32, i32, i32) {
    %c0_i32 = arith.constant 0 : i32
    %c0_i32_0 = arith.constant 0 : i32
    %c0_i32_1 = arith.constant 0 : i32
    %c0_i32_2 = arith.constant 0 : i32
    return %c0_i32, %c0_i32_0, %c0_i32_1 : i32, i32, i32
  }
  func.func @transform_11(%arg0: i32) -> (i32, i32) {
    %c0_i32 = arith.constant 0 : i32
    %c0_i32_0 = arith.constant 0 : i32
    return %arg0, %c0_i32 : i32, i32
  }
}

</mosaic_0001>

<bundles_post_ra>
// kernel: tpu_custom_call.1
= control target key start
LH: loop header
LB: loop body
LE: loop exit
PB: predicated region body
PF: predicated region fallthrough
CT: control target
= control target key end

     0   :  { %16 = vsyncpa [#allocation3], 0  ;;  %s1009_s0 = inlined_call_operand.hbm [shape: f32[8,128], index: 0, kind: input, shape index: {}]   ;;  %s1010_s1 = inlined_call_operand.vmem [shape: f32[1,128], index: 1, kind: input, shape index: {}]   ;;  %s1011_s2 = inlined_call_operand.hbm [shape: f32[1,128], index: 2, kind: input, shape index: {}]   ;;  %s1012_s3 = inlined_call_operand.hbm [shape: f32[128,128], index: 3, kind: input, shape index: {}]   ;;  %s1013_s4 = inlined_call_operand.hbm [shape: f32[1,128], index: 4, kind: input, shape index: {}]   ;;  %s1014_s5 = inlined_call_operand.vmem [shape: f32[1,128], index: 5, kind: input, shape index: {}]   ;;  %s1015_s6 = inlined_call_operand.vmem [shape: f32[1,128], index: 6, kind: input, shape index: {}]   ;;  %s1016_s7 = inlined_call_operand.hbm [shape: f32[2,128,128], index: 7, kind: input, shape index: {}]   ;;  %s1017_s8 = inlined_call_operand.vmem [shape: f32[2,1,128], index: 8, kind: input, shape index: {}]   ;;  %s1018_s9 = inlined_call_operand.vmem [shape: f32[2,1,128], index: 9, kind: input, shape index: {}]   ;;  %s1019_s10 = inlined_call_operand.vmem [shape: f32[2,1,128], index: 10, kind: input, shape index: {}]   ;;  %s1020_s11 = inlined_call_operand.hbm [shape: f32[8,128], index: 11, kind: output, shape index: {}]  }
   0x1   :  { %17 = vsyncpa [#allocation6], 0 }
   0x2   :  { %18 = vsyncpa [#allocation9], 0 }
   0x3   :  { %19 = vsyncpa [#allocation4], 0  ;;  %s840_s17 = smov [#allocation5]   ;;  %s841_s19 = smov [#allocation8]  }
   0x4   :  { %s38_s18 = sshll.u32 %s840_s17, 4  ;;  %s60_s20 = sshll.u32 %s841_s19, 4  ;;  %s39_s18 = int_to_ptr.vmem [resolvable:$true] %s38_s18  ;;  %s61_s20 = int_to_ptr.vmem [resolvable:$true] %s60_s20 }
   0x5   :  { %s720_s21 = scalar_lea.vmem %s39_s18, 16  ;;  %s724_s22 = scalar_lea.vmem %s39_s18, 32 }
   0x6   :  { %p721_p0 = scmp.ne.s32.totalorder %s39_s18, %s720_s21  ;;  %p725_p1 = scmp.lt.s32.totalorder %s39_s18, %s39_s18 }
   0x7   :  { %p726_p2 = scmp.lt.s32.totalorder %s724_s22, %s720_s21 }
   0x9   :  { %p727_p3 = por %p726_p2, %p725_p1 }
   0xb   :  { %p728_p4 = pnand %p727_p3, %p721_p0 }
   0xd   :  { %731 = shalt.err (!%p728_p4)
}
   0xe   :  { %41 = dma.hbm_to_vmem [thread:$0]  %s1011_s2, 16, %s39_s18, [#allocation6]  }
   0xf   :  { %s740_s25 = scalar_lea.vmem %s61_s20, 16  ;;  %s744_s26 = scalar_lea.vmem %s61_s20, 32 }
  0x10   :  { %p741_p5 = scmp.ne.s32.totalorder %s61_s20, %s740_s25  ;;  %p745_p6 = scmp.lt.s32.totalorder %s61_s20, %s61_s20 }
  0x11   :  { %p746_p7 = scmp.lt.s32.totalorder %s744_s26, %s740_s25 }
  0x13   :  { %p747_p8 = por %p746_p7, %p745_p6 }
  0x15   :  { %p748_p9 = pnand %p747_p8, %p741_p5 }
  0x17   :  { %751 = shalt.err (!%p748_p9)
}
  0x18   :  { %63 = dma.hbm_to_vmem [thread:$0]  %s1013_s4, 16, %s61_s20, [#allocation9]  }
  0x19   :  { %s842_s29 = smov [#allocation2]   ;;  %s843_s12 = smov [#allocation7]  }
  0x1a   :  { %s26_s30 = sshll.u32 %s842_s29, 4  ;;  %s47_s13 = sshll.u32 %s843_s12, 4  ;;  %s27_s30 = int_to_ptr.vmem [resolvable:$true] %s26_s30  ;;  %s48_s13 = int_to_ptr.vmem [resolvable:$true] %s47_s13 }
  0x1b   :  { %s760_s14 = scalar_lea.vmem %s27_s30, 128  ;;  %p765_p11 = scmp.lt.s32.totalorder %s27_s30, %s27_s30 }
  0x1c   :  { %p761_p10 = scmp.ne.s32.totalorder %s27_s30, %s760_s14  ;;  %p766_p12 = scmp.lt.s32.totalorder %s760_s14, %s760_s14 }
  0x1e   :  { %p767_p13 = por %p766_p12, %p765_p11 }
  0x20   :  { %p768_p0 = pnand %p767_p13, %p761_p10 }
  0x22   :  { %771 = shalt.err (!%p768_p0)
}
  0x23   :  { %29 = dma.hbm_to_vmem [thread:$0]  %s1009_s0, 128, %s27_s30, [#allocation3]  }
  0x24   :  { %s780_s16 = scalar_lea.vmem %s48_s13, 2048  ;;  %p785_p2 = scmp.lt.s32.totalorder %s48_s13, %s48_s13 }
  0x25   :  { %p781_p1 = scmp.ne.s32.totalorder %s48_s13, %s780_s16  ;;  %p786_p3 = scmp.lt.s32.totalorder %s780_s16, %s780_s16 }
  0x27   :  { %p787_p4 = por %p786_p3, %p785_p2 }
  0x29   :  { %p788_p5 = pnand %p787_p4, %p781_p1 }
  0x2b   :  { %791 = shalt.err (!%p788_p5)
}
  0x2c   :  { %s844_s4 = smov 128   ;;  %s845_s17 = smov 8  }
  0x2d   :  { %53 = dma.hbm_to_vmem [thread:$0]  %s1012_s3, 2048, %s48_s13, [#allocation6], %s844_s4, %s844_s4, %s845_s17  }
  0x2e   :  { %s846_s20 = smov [#allocation10]  }
  0x2f   :  { %s73_s21 = sshll.u32 %s846_s20, 4  ;;  %s74_s21 = int_to_ptr.vmem [resolvable:$true] %s73_s21 }
  0x30   :  { %s800_s22 = scalar_lea.vmem %s74_s21, 4096  ;;  %p805_p7 = scmp.lt.s32.totalorder %s74_s21, %s74_s21 }
  0x31   :  { %p801_p6 = scmp.ne.s32.totalorder %s74_s21, %s800_s22  ;;  %p806_p8 = scmp.lt.s32.totalorder %s800_s22, %s800_s22 }
  0x33   :  { %p807_p9 = por %p806_p8, %p805_p7 }
  0x35   :  { %p808_p10 = pnand %p807_p9, %p801_p6 }
  0x37   :  { %811 = shalt.err (!%p808_p10)
}
  0x38   :  { %79 = dma.hbm_to_vmem [thread:$0]  %s1016_s7, 4096, %s74_s21, [#allocation9], %s844_s4, %s844_s4, %s845_s17  }
  0x39   :  { %832 = dma.done.wait [#allocation3], 128  }
  0x3a   :  { %833 = vsyncadd [#allocation3], 4294967168 }
  0x3b   :  { %834 = dma.done.wait [#allocation6], 2064  }
  0x3c   :  { %835 = vsyncadd [#allocation6], 4294965232 }
  0x3d   :  { %836 = dma.done.wait [#allocation9], 4112  }
  0x3e   :  { %837 = vsyncadd [#allocation9], 4294963184  ;;  %v101_v0 = vld [vmem:[#allocation2] sm:$0xff]  ;;  %v847_v2 = vmov 0.0   ;;  %v146_v4 = vld [vmem:[#allocation7 + $0x68] sm:$0xff]  ;;  %v108_v6 = vlaneseq  ;;  %vm848_vm1 = vmmov 0  }
  0x3f   :  { %104 = vadd.xlane.f32.xlu0 %v101_v0  ;;  %v148_v1 = vld [vmem:[#allocation7 + $0x78] sm:$0xff]  ;;  %589 = vmatprep.subr.mxu0 %v847_v2  ;;  %v147_v3 = vld [vmem:[#allocation7 + $0x70] sm:$0xff]  ;;  %v145_v5 = vld [vmem:[#allocation7 + $0x60] sm:$0xff]  ;;  %s849_s16 = smov [#allocation11]  }
  0x40   :  { %624 = vmatprep.subr.mxu1 %v847_v2  ;;  %590 = vmatpush3.msra.mxu0 %v148_v1  ;;  %v109_v7 = vand.u32 127, %v108_v6  ;;  %v144_v13 = vld [vmem:[#allocation7 + $0x58] sm:$0xff]  ;;  %v143_v14 = vld [vmem:[#allocation7 + $0x50] sm:$0xff]  ;;  %v142_v15 = vld [vmem:[#allocation7 + $0x48] sm:$0xff]  ;;  %s513_s4 = sshll.u32 %s849_s16, 4  ;;  %s514_s4 = int_to_ptr.vmem [resolvable:$true] %s513_s4 }
  0x41   :  { %591 = vmatprep.subr.mxu0 %v847_v2  ;;  %v141_v16 = vld [vmem:[#allocation7 + $0x40] sm:$0xff]  ;;  %621 = vmatprep.mubr.msk.f32.mxu0 %vm848_vm1, %v847_v2  ;;  %v140_v17 = vld [vmem:[#allocation7 + $0x38] sm:$0xff]  ;;  %v139_v18 = vld [vmem:[#allocation7 + $0x30] sm:$0xff]  ;;  %s812_s17 = scalar_lea.vmem %s514_s4, 128  ;;  %p817_p12 = scmp.lt.s32.totalorder %s514_s4, %s514_s4 }
  0x42   :  { %592 = vmatpush3.msra.mxu0 %v147_v3  ;;  %vm110_vm0 = vcmp.lt.s32.totalorder %v109_v7, 20  ;;  %656 = vmatprep.mubr.msk.f32.mxu1 %vm848_vm1, %v847_v2  ;;  %v138_v19 = vld [vmem:[#allocation7 + $0x28] sm:$0xff]  ;;  %v137_v20 = vld [vmem:[#allocation7 + $0x20] sm:$0xff]  ;;  %v136_v21 = vld [vmem:[#allocation7 + $0x18] sm:$0xff]  ;;  %p813_p11 = scmp.ne.s32.totalorder %s514_s4, %s812_s17  ;;  %p818_p13 = scmp.lt.s32.totalorder %s812_s17, %s812_s17 }
  0x43   :  { %593 = vmatprep.subr.mxu0 %v847_v2  ;;  %v135_v22 = vld [vmem:[#allocation7 + $0x10] sm:$0xff]  ;;  %v134_v23 = vld [vmem:[#allocation7 + $0x8] sm:$0xff]  ;;  %v133_v24 = vld [vmem:[#allocation7] sm:$0xff] }
  0x44   :  { %594 = vmatpush3.msra.mxu0 %v146_v4  ;;  %v524_v29 = vld [vmem:[%s1010_s1] ss:$0 sm:$0xff]  ;;  %v525_v31 = vld [vmem:[#allocation5] ss:$0 sm:$0xff]  ;;  %v526_v35 = vld [vmem:[#allocation8] ss:$0 sm:$0xff]  ;;  %p819_p0 = por %p818_p13, %p817_p12 }
  0x45   :  { %595 = vmatprep.subr.mxu0 %v847_v2  ;;  %v271_v34 = vld [vmem:[#allocation10 + $0x78] sm:$0xff]  ;;  %v270_v41 = vld [vmem:[#allocation10 + $0x70] sm:$0xff]  ;;  %v269_v42 = vld [vmem:[#allocation10 + $0x68] sm:$0xff] }
  0x46   :  { %596 = vmatpush3.msra.mxu0 %v145_v5  ;;  %625 = vmatpush3.msra.mxu1 %v271_v34  ;;  %v268_v43 = vld [vmem:[#allocation10 + $0x60] sm:$0xff]  ;;  %v267_v44 = vld [vmem:[#allocation10 + $0x58] sm:$0xff]  ;;  %v266_v45 = vld [vmem:[#allocation10 + $0x50] sm:$0xff]  ;;  %p820_p1 = pnand %p819_p0, %p813_p11 }
  0x47   :  { %597 = vmatprep.subr.mxu0 %v847_v2  ;;  %626 = vmatprep.subr.mxu1 %v847_v2  ;;  %v265_v46 = vld [vmem:[#allocation10 + $0x48] sm:$0xff]  ;;  %v264_v47 = vld [vmem:[#allocation10 + $0x40] sm:$0xff]  ;;  %v263_v48 = vld [vmem:[#allocation10 + $0x38] sm:$0xff] }
  0x48   :  { %598 = vmatpush3.msra.mxu0 %v144_v13  ;;  %627 = vmatpush3.msra.mxu1 %v270_v41  ;;  %v262_v49 = vld [vmem:[#allocation10 + $0x30] sm:$0xff]  ;;  %v261_v50 = vld [vmem:[#allocation10 + $0x28] sm:$0xff]  ;;  %v260_v51 = vld [vmem:[#allocation10 + $0x20] sm:$0xff] }
  0x49   :  { %599 = vmatprep.subr.mxu0 %v847_v2  ;;  %628 = vmatprep.subr.mxu1 %v847_v2  ;;  %v259_v52 = vld [vmem:[#allocation10 + $0x18] sm:$0xff]  ;;  %v258_v53 = vld [vmem:[#allocation10 + $0x10] sm:$0xff]  ;;  %v257_v54 = vld [vmem:[#allocation10 + $0x8] sm:$0xff] }
  0x4a   :  { %600 = vmatpush3.msra.mxu0 %v143_v14  ;;  %629 = vmatpush3.msra.mxu1 %v269_v42  ;;  %v256_v55 = vld [vmem:[#allocation10] sm:$0xff]  ;;  %v527_v1 = vld [vmem:[%s1014_s5] ss:$0 sm:$0xff]  ;;  %v395_v7 = vld [vmem:[#allocation10 + $0xf8] sm:$0xff] }
  0x4b   :  { %601 = vmatprep.subr.mxu0 %v847_v2  ;;  %630 = vmatprep.subr.mxu1 %v847_v2  ;;  %v528_v4 = vld [vmem:[%s1015_s6] ss:$0 sm:$0xff]  ;;  %v533_v42 = vld [vmem:[%s1017_s8 + $0x1] ss:$0 sm:$0xff] }
  0x4c   :  { %602 = vmatpush3.msra.mxu0 %v142_v15  ;;  %631 = vmatpush3.msra.mxu1 %v268_v43  ;;  %v393_v15 = vld [vmem:[#allocation10 + $0xe8] sm:$0xff] }
  0x4d   :  { %603 = vmatprep.subr.mxu0 %v847_v2  ;;  %632 = vmatprep.subr.mxu1 %v847_v2 }
  0x4e   :  { %604 = vmatpush3.msra.mxu0 %v141_v16  ;;  %633 = vmatpush3.msra.mxu1 %v267_v44  ;;  %v392_v16 = vld [vmem:[#allocation10 + $0xe0] sm:$0xff] }
  0x4f   :  { %605 = vmatprep.subr.mxu0 %v847_v2  ;;  %634 = vmatprep.subr.mxu1 %v847_v2 }
  0x50   :  { %606 = vmatpush3.msra.mxu0 %v140_v17  ;;  %635 = vmatpush3.msra.mxu1 %v266_v45  ;;  %v391_v17 = vld [vmem:[#allocation10 + $0xd8] sm:$0xff] }
  0x51   :  { %607 = vmatprep.subr.mxu0 %v847_v2  ;;  %636 = vmatprep.subr.mxu1 %v847_v2 }
  0x52   :  { %608 = vmatpush3.msra.mxu0 %v139_v18  ;;  %637 = vmatpush3.msra.mxu1 %v265_v46  ;;  %v390_v18 = vld [vmem:[#allocation10 + $0xd0] sm:$0xff] }
  0x53   :  { %609 = vmatprep.subr.mxu0 %v847_v2  ;;  %638 = vmatprep.subr.mxu1 %v847_v2 }
  0x54   :  { %610 = vmatpush3.msra.mxu0 %v138_v19  ;;  %639 = vmatpush3.msra.mxu1 %v264_v47  ;;  %v389_v19 = vld [vmem:[#allocation10 + $0xc8] sm:$0xff] }
  0x55   :  { %611 = vmatprep.subr.mxu0 %v847_v2  ;;  %640 = vmatprep.subr.mxu1 %v847_v2 }
  0x56   :  { %612 = vmatpush3.msra.mxu0 %v137_v20  ;;  %641 = vmatpush3.msra.mxu1 %v263_v48  ;;  %v388_v20 = vld [vmem:[#allocation10 + $0xc0] sm:$0xff] }
  0x57   :  { %613 = vmatprep.subr.mxu0 %v847_v2  ;;  %642 = vmatprep.subr.mxu1 %v847_v2 }
  0x58   :  { %614 = vmatpush3.msra.mxu0 %v136_v21  ;;  %643 = vmatpush3.msra.mxu1 %v262_v49  ;;  %v387_v21 = vld [vmem:[#allocation10 + $0xb8] sm:$0xff] }
  0x59   :  { %615 = vmatprep.subr.mxu0 %v847_v2  ;;  %644 = vmatprep.subr.mxu1 %v847_v2 }
  0x5a   :  { %616 = vmatpush3.msra.mxu0 %v135_v22  ;;  %645 = vmatpush3.msra.mxu1 %v261_v50  ;;  %v386_v22 = vld [vmem:[#allocation10 + $0xb0] sm:$0xff] }
  0x5b   :  { %617 = vmatprep.subr.mxu0 %v847_v2  ;;  %646 = vmatprep.subr.mxu1 %v847_v2 }
  0x5c   :  { %618 = vmatpush3.msra.mxu0 %v134_v23  ;;  %647 = vmatpush3.msra.mxu1 %v260_v51  ;;  %v385_v23 = vld [vmem:[#allocation10 + $0xa8] sm:$0xff] }
  0x5d   :  { %619 = vmatprep.subr.mxu0 %v847_v2  ;;  %648 = vmatprep.subr.mxu1 %v847_v2 }
  0x5e   :  { %620 = vmatpush3.msra.mxu0 %v133_v24  ;;  %649 = vmatpush3.msra.mxu1 %v259_v52  ;;  %v384_v24 = vld [vmem:[#allocation10 + $0xa0] sm:$0xff] }
  0x5f   :  { %659 = vmatprep.subr.mxu0 %v847_v2  ;;  %650 = vmatprep.subr.mxu1 %v847_v2 }
  0x60   :  { %651 = vmatpush3.msra.mxu1 %v258_v53 }
  0x61   :  { %652 = vmatprep.subr.mxu1 %v847_v2 }
  0x62   :  { %653 = vmatpush3.msra.mxu1 %v257_v54 }
  0x63   :  { %654 = vmatprep.subr.mxu1 %v847_v2 }
  0x64   :  { %655 = vmatpush3.msra.mxu1 %v256_v55 }
  0xc8   :  { %v105_v8 = vpop.xlane.xlu0 %104 }
  0xc9   :  { %v106_v9 = vmul.f32 0.05, %v105_v8  ;;  %v394_v8 = vld [vmem:[#allocation10 + $0xf0] sm:$0xff] }
  0xcb   :  { %v107_v10 = vsub.f32 %v101_v0, %v106_v9  ;;  %v529_v9 = vld [vmem:[%s1017_s8] ss:$0 sm:$0xff] }
  0xcd   :  { %v111_v11 = vsel %vm110_vm0, %v107_v10, 0.0 }
  0xce   :  { %v112_v12 = vmul.f32 %v111_v11, %v111_v11 }
  0xd0   :  { %113 = vadd.xlane.f32.xlu0 %v112_v12 }
 0x159   :  { %v114_v25 = vpop.xlane.xlu0 %113 }
 0x15a   :  { %v115_v26 = vmul.f32 0.05, %v114_v25  ;;  %v383_v25 = vld [vmem:[#allocation10 + $0x98] sm:$0xff] }
 0x15c   :  { %v116_v27 = vadd.f32 1e-05, %v115_v26  ;;  %v382_v26 = vld [vmem:[#allocation10 + $0x90] sm:$0xff] }
 0x15e   :  { %704 = vrsqrt.f32 %v116_v27  ;;  %v381_v27 = vld [vmem:[#allocation10 + $0x88] sm:$0xff] }
 0x16b   :  { %v705_v28 = vpop.eup %704 }
 0x16c   :  { %v118_v30 = vmul.f32 %v705_v28, %v111_v11  ;;  %v380_v28 = vld [vmem:[#allocation10 + $0x80] sm:$0xff] }
 0x16e   :  { %v125_v32 = vmul.f32 %v524_v29, %v118_v30 }
 0x170   :  { %v132_v33 = vadd.f32 %v525_v31, %v125_v32 }
 0x172   :  { %622 = vmatmul.mubr.f32.vlgmr.msra.gmra.mxu0 %v132_v33 }
 0x173   :  { %691 = vmatprep.mubr.msk.f32.mxu0 %vm848_vm1, %v847_v2  ;;  %660 = vmatpush3.msra.mxu0 %v395_v7 }
 0x174   :  { %661 = vmatprep.subr.mxu0 %v847_v2 }
 0x175   :  { %662 = vmatpush3.msra.mxu0 %v394_v8 }
 0x176   :  { %663 = vmatprep.subr.mxu0 %v847_v2 }
 0x177   :  { %664 = vmatpush3.msra.mxu0 %v393_v15 }
 0x178   :  { %665 = vmatprep.subr.mxu0 %v847_v2 }
 0x179   :  { %666 = vmatpush3.msra.mxu0 %v392_v16 }
 0x17a   :  { %667 = vmatprep.subr.mxu0 %v847_v2 }
 0x17b   :  { %668 = vmatpush3.msra.mxu0 %v391_v17 }
 0x17c   :  { %669 = vmatprep.subr.mxu0 %v847_v2 }
 0x17d   :  { %670 = vmatpush3.msra.mxu0 %v390_v18 }
 0x17e   :  { %671 = vmatprep.subr.mxu0 %v847_v2 }
 0x17f   :  { %672 = vmatpush3.msra.mxu0 %v389_v19 }
 0x180   :  { %673 = vmatprep.subr.mxu0 %v847_v2 }
 0x181   :  { %674 = vmatpush3.msra.mxu0 %v388_v20 }
 0x182   :  { %675 = vmatprep.subr.mxu0 %v847_v2 }
 0x183   :  { %676 = vmatpush3.msra.mxu0 %v387_v21 }
 0x184   :  { %677 = vmatprep.subr.mxu0 %v847_v2 }
 0x185   :  { %678 = vmatpush3.msra.mxu0 %v386_v22 }
 0x186   :  { %679 = vmatprep.subr.mxu0 %v847_v2 }
 0x187   :  { %680 = vmatpush3.msra.mxu0 %v385_v23 }
 0x188   :  { %681 = vmatprep.subr.mxu0 %v847_v2 }
 0x189   :  { %682 = vmatpush3.msra.mxu0 %v384_v24 }
 0x18a   :  { %683 = vmatprep.subr.mxu0 %v847_v2 }
 0x18b   :  { %684 = vmatpush3.msra.mxu0 %v383_v25 }
 0x18c   :  { %685 = vmatprep.subr.mxu0 %v847_v2 }
 0x18d   :  { %686 = vmatpush3.msra.mxu0 %v382_v26 }
 0x18e   :  { %687 = vmatprep.subr.mxu0 %v847_v2 }
 0x18f   :  { %688 = vmatpush3.msra.mxu0 %v381_v27 }
 0x190   :  { %689 = vmatprep.subr.mxu0 %v847_v2  ;;  %v531_v2 = vld [vmem:[%s1019_s10] ss:$0 sm:$0xff] }
 0x191   :  { %690 = vmatpush3.msra.mxu0 %v380_v28 }
 0x232   :  { %v222_v36 = vpop.f32.mrf.mxu0 }
 0x233   :  { %v223_v37 = vadd.f32 %v526_v35, %v222_v36 }
 0x234   :  { %v623_v38 = vpop.f32.mrf.mxu0 }
 0x235   :  { %v226_v39 = vmax.f32 %v223_v37, 0.0  ;;  %v530_v38 = vld [vmem:[%s1018_s9] ss:$0 sm:$0xff] }
 0x237   :  { %229 = vadd.xlane.f32.xlu1 %v226_v39  ;;  %v231_v40 = vmul.f32 %v226_v39, %v226_v39 }
 0x23b   :  { %232 = vadd.xlane.f32.xlu1 %v231_v40 }
 0x2c0   :  { %v230_v56 = vpop.xlane.xlu1 %229 }
 0x2c1   :  { %v234_v57 = vmul.f32 0.015625, %v230_v56 }
 0x2c3   :  { %v236_v59 = vmul.f32 %v234_v57, %v234_v57  ;;  %v240_v63 = vsub.f32 %v226_v39, %v234_v57  ;;  %v536_v57 = vld [vmem:[%s1018_s9 + $0x1] ss:$0 sm:$0xff] }
 0x2c4   :  { %v233_v58 = vpop.xlane.xlu1 %232 }
 0x2c5   :  { %v235_v60 = vmul.f32 0.015625, %v233_v58 }
 0x2c7   :  { %v237_v61 = vsub.f32 %v235_v60, %v236_v59  ;;  %v537_v59 = vld [vmem:[%s1019_s10 + $0x1] ss:$0 sm:$0xff] }
 0x2c9   :  { %v238_v62 = vadd.f32 1e-05, %v237_v61 }
 0x2cb   :  { %706 = vrsqrt.f32 %v238_v62 }
 0x2d8   :  { %v707_v0 = vpop.eup %706 }
 0x2d9   :  { %v241_v3 = vmul.f32 %v707_v0, %v240_v63 }
 0x2db   :  { %v248_v5 = vmul.f32 %v527_v1, %v241_v3 }
 0x2dd   :  { %v255_v6 = vadd.f32 %v528_v4, %v248_v5 }
 0x2df   :  { %657 = vmatmul.mubr.f32.vlgmr.msra.gmra.mxu1 %v255_v6 }
 0x39f   :  { %v345_v10 = vpop.f32.mrf.mxu1 }
 0x3a0   :  { %v346_v11 = vadd.f32 %v529_v9, %v345_v10 }
 0x3a1   :  { %v658_v12 = vpop.f32.mrf.mxu1 }
 0x3a2   :  { %v349_v13 = vmax.f32 %v346_v11, 0.0 }
 0x3a4   :  { %352 = vadd.xlane.f32.xlu0 %v349_v13  ;;  %v354_v14 = vmul.f32 %v349_v13, %v349_v13 }
 0x3a6   :  { %355 = vadd.xlane.f32.xlu1 %v354_v14 }
 0x42d   :  { %v353_v29 = vpop.xlane.xlu0 %352 }
 0x42e   :  { %v357_v30 = vmul.f32 0.015625, %v353_v29 }
 0x42f   :  { %v356_v31 = vpop.xlane.xlu1 %355 }
 0x430   :  { %v359_v32 = vmul.f32 %v357_v30, %v357_v30  ;;  %v358_v33 = vmul.f32 0.015625, %v356_v31  ;;  %v363_v36 = vsub.f32 %v349_v13, %v357_v30 }
 0x432   :  { %v360_v34 = vsub.f32 %v358_v33, %v359_v32 }
 0x434   :  { %v361_v35 = vadd.f32 1e-05, %v360_v34 }
 0x436   :  { %708 = vrsqrt.f32 %v361_v35 }
 0x443   :  { %v709_v37 = vpop.eup %708 }
 0x444   :  { %v364_v39 = vmul.f32 %v709_v37, %v363_v36 }
 0x446   :  { %v371_v40 = vmul.f32 %v530_v38, %v364_v39 }
 0x448   :  { %v378_v41 = vadd.f32 %v531_v2, %v371_v40 }
 0x44a   :  { %692 = vmatmul.mubr.f32.vlgmr.msra.gmra.mxu0 %v378_v41 }
 0x50a   :  { %v470_v43 = vpop.f32.mrf.mxu0 }
 0x50b   :  { %v471_v44 = vadd.f32 %v533_v42, %v470_v43 }
 0x50c   :  { %v693_v45 = vpop.f32.mrf.mxu0 }
 0x50d   :  { %v474_v46 = vmax.f32 %v471_v44, 0.0 }
 0x50f   :  { %479 = vadd.xlane.f32.xlu0 %v474_v46  ;;  %v481_v47 = vmul.f32 %v474_v46, %v474_v46 }
 0x511   :  { %482 = vadd.xlane.f32.xlu1 %v481_v47 }
 0x598   :  { %v480_v48 = vpop.xlane.xlu0 %479 }
 0x599   :  { %v484_v49 = vmul.f32 0.015625, %v480_v48 }
 0x59a   :  { %v483_v50 = vpop.xlane.xlu1 %482 }
 0x59b   :  { %v486_v51 = vmul.f32 %v484_v49, %v484_v49  ;;  %v485_v52 = vmul.f32 0.015625, %v483_v50  ;;  %v490_v55 = vsub.f32 %v474_v46, %v484_v49 }
 0x59d   :  { %v487_v53 = vsub.f32 %v485_v52, %v486_v51 }
 0x59f   :  { %v488_v54 = vadd.f32 1e-05, %v487_v53 }
 0x5a1   :  { %710 = vrsqrt.f32 %v488_v54 }
 0x5ae   :  { %v711_v56 = vpop.eup %710 }
 0x5af   :  { %v491_v58 = vmul.f32 %v711_v56, %v490_v55 }
 0x5b1   :  { %v498_v60 = vmul.f32 %v536_v57, %v491_v58 }
 0x5b3   :  { %v505_v61 = vadd.f32 %v537_v59, %v498_v60 }
 0x5b5   :  { %506 = vst [vmem:[#allocation11] sm:$0xff] %v505_v61 }
 0x5b6   :  { %823 = shalt.err (!%p820_p1)
}
 0x5b7   :  { %516 = dma.vmem_to_hbm [thread:$0]  %s514_s4, 128, %s1020_s11, [#allocation4]  }
 0x5b8   :  { %838 = dma.done.wait [#allocation4], 128  }
 0x5b9   :  { %839 = vsyncadd [#allocation4], 4294967168 }
 0x5ba   :  { %520 = vsyncpa [#allocation3], 1 }
 0x5bb   :  { %521 = vsyncpa [#allocation6], 1 }
 0x5bc   :  { %522 = vsyncpa [#allocation9], 1 }
 0x5bd   :  { %523 = vsyncpa [#allocation4], 1 }

// kernel: tpu_custom_call.1
= control target key start
LH: loop header
LB: loop body
LE: loop exit
PB: predicated region body
PF: predicated region fallthrough
CT: control target
= control target key end

     0   :  { %16 = vsyncpa [#allocation3], 0  ;;  %s1009_s0 = inlined_call_operand.hbm [shape: f32[8,128], index: 0, kind: input, shape index: {}]   ;;  %s1010_s1 = inlined_call_operand.vmem [shape: f32[1,128], index: 1, kind: input, shape index: {}]   ;;  %s1011_s2 = inlined_call_operand.hbm [shape: f32[1,128], index: 2, kind: input, shape index: {}]   ;;  %s1012_s3 = inlined_call_operand.hbm [shape: f32[128,128], index: 3, kind: input, shape index: {}]   ;;  %s1013_s4 = inlined_call_operand.hbm [shape: f32[1,128], index: 4, kind: input, shape index: {}]   ;;  %s1014_s5 = inlined_call_operand.vmem [shape: f32[1,128], index: 5, kind: input, shape index: {}]   ;;  %s1015_s6 = inlined_call_operand.vmem [shape: f32[1,128], index: 6, kind: input, shape index: {}]   ;;  %s1016_s7 = inlined_call_operand.hbm [shape: f32[2,128,128], index: 7, kind: input, shape index: {}]   ;;  %s1017_s8 = inlined_call_operand.vmem [shape: f32[2,1,128], index: 8, kind: input, shape index: {}]   ;;  %s1018_s9 = inlined_call_operand.vmem [shape: f32[2,1,128], index: 9, kind: input, shape index: {}]   ;;  %s1019_s10 = inlined_call_operand.vmem [shape: f32[2,1,128], index: 10, kind: input, shape index: {}]   ;;  %s1020_s11 = inlined_call_operand.hbm [shape: f32[8,128], index: 11, kind: output, shape index: {}]  }
   0x1   :  { %17 = vsyncpa [#allocation6], 0 }
   0x2   :  { %18 = vsyncpa [#allocation9], 0 }
   0x3   :  { %19 = vsyncpa [#allocation4], 0  ;;  %s840_s17 = smov [#allocation5]   ;;  %s841_s19 = smov [#allocation8]  }
   0x4   :  { %s38_s18 = sshll.u32 %s840_s17, 4  ;;  %s60_s20 = sshll.u32 %s841_s19, 4  ;;  %s39_s18 = int_to_ptr.vmem [resolvable:$true] %s38_s18  ;;  %s61_s20 = int_to_ptr.vmem [resolvable:$true] %s60_s20 }
   0x5   :  { %s720_s21 = scalar_lea.vmem %s39_s18, 16  ;;  %s724_s22 = scalar_lea.vmem %s39_s18, 32 }
   0x6   :  { %p721_p0 = scmp.ne.s32.totalorder %s39_s18, %s720_s21  ;;  %p725_p1 = scmp.lt.s32.totalorder %s39_s18, %s39_s18 }
   0x7   :  { %p726_p2 = scmp.lt.s32.totalorder %s724_s22, %s720_s21 }
   0x9   :  { %p727_p3 = por %p726_p2, %p725_p1 }
   0xb   :  { %p728_p4 = pnand %p727_p3, %p721_p0 }
   0xd   :  { %731 = shalt.err (!%p728_p4)
}
   0xe   :  { %41 = dma.hbm_to_vmem [thread:$0]  %s1011_s2, 16, %s39_s18, [#allocation6]  }
   0xf   :  { %s740_s25 = scalar_lea.vmem %s61_s20, 16  ;;  %s744_s26 = scalar_lea.vmem %s61_s20, 32 }
  0x10   :  { %p741_p5 = scmp.ne.s32.totalorder %s61_s20, %s740_s25  ;;  %p745_p6 = scmp.lt.s32.totalorder %s61_s20, %s61_s20 }
  0x11   :  { %p746_p7 = scmp.lt.s32.totalorder %s744_s26, %s740_s25 }
  0x13   :  { %p747_p8 = por %p746_p7, %p745_p6 }
  0x15   :  { %p748_p9 = pnand %p747_p8, %p741_p5 }
  0x17   :  { %751 = shalt.err (!%p748_p9)
}
  0x18   :  { %63 = dma.hbm_to_vmem [thread:$0]  %s1013_s4, 16, %s61_s20, [#allocation9]  }
  0x19   :  { %s842_s29 = smov [#allocation2]   ;;  %s843_s12 = smov [#allocation7]  }
  0x1a   :  { %s26_s30 = sshll.u32 %s842_s29, 4  ;;  %s47_s13 = sshll.u32 %s843_s12, 4  ;;  %s27_s30 = int_to_ptr.vmem [resolvable:$true] %s26_s30  ;;  %s48_s13 = int_to_ptr.vmem [resolvable:$true] %s47_s13 }
  0x1b   :  { %s760_s14 = scalar_lea.vmem %s27_s30, 128  ;;  %p765_p11 = scmp.lt.s32.totalorder %s27_s30, %s27_s30 }
  0x1c   :  { %p761_p10 = scmp.ne.s32.totalorder %s27_s30, %s760_s14  ;;  %p766_p12 = scmp.lt.s32.totalorder %s760_s14, %s760_s14 }
  0x1e   :  { %p767_p13 = por %p766_p12, %p765_p11 }
  0x20   :  { %p768_p0 = pnand %p767_p13, %p761_p10 }
  0x22   :  { %771 = shalt.err (!%p768_p0)
}
  0x23   :  { %29 = dma.hbm_to_vmem [thread:$0]  %s1009_s0, 128, %s27_s30, [#allocation3]  }
  0x24   :  { %s780_s16 = scalar_lea.vmem %s48_s13, 2048  ;;  %p785_p2 = scmp.lt.s32.totalorder %s48_s13, %s48_s13 }
  0x25   :  { %p781_p1 = scmp.ne.s32.totalorder %s48_s13, %s780_s16  ;;  %p786_p3 = scmp.lt.s32.totalorder %s780_s16, %s780_s16 }
  0x27   :  { %p787_p4 = por %p786_p3, %p785_p2 }
  0x29   :  { %p788_p5 = pnand %p787_p4, %p781_p1 }
  0x2b   :  { %791 = shalt.err (!%p788_p5)
}
  0x2c   :  { %s844_s4 = smov 128   ;;  %s845_s17 = smov 8  }
  0x2d   :  { %53 = dma.hbm_to_vmem [thread:$0]  %s1012_s3, 2048, %s48_s13, [#allocation6], %s844_s4, %s844_s4, %s845_s17  }
  0x2e   :  { %s846_s20 = smov [#allocation10]  }
  0x2f   :  { %s73_s21 = sshll.u32 %s846_s20, 4  ;;  %s74_s21 = int_to_ptr.vmem [resolvable:$true] %s73_s21 }
  0x30   :  { %s800_s22 = scalar_lea.vmem %s74_s21, 4096  ;;  %p805_p7 = scmp.lt.s32.totalorder %s74_s21, %s74_s21 }
  0x31   :  { %p801_p6 = scmp.ne.s32.totalorder %s74_s21, %s800_s22  ;;  %p806_p8 = scmp.lt.s32.totalorder %s800_s22, %s800_s22 }
  0x33   :  { %p807_p9 = por %p806_p8, %p805_p7 }
  0x35   :  { %p808_p10 = pnand %p807_p9, %p801_p6 }
  0x37   :  { %811 = shalt.err (!%p808_p10)
}
  0x38   :  { %79 = dma.hbm_to_vmem [thread:$0]  %s1016_s7, 4096, %s74_s21, [#allocation9], %s844_s4, %s844_s4, %s845_s17  }
  0x39   :  { %832 = dma.done.wait [#allocation3], 128  }
  0x3a   :  { %833 = vsyncadd [#allocation3], 4294967168 }
  0x3b   :  { %834 = dma.done.wait [#allocation6], 2064  }
  0x3c   :  { %835 = vsyncadd [#allocation6], 4294965232 }
  0x3d   :  { %836 = dma.done.wait [#allocation9], 4112  }
  0x3e   :  { %837 = vsyncadd [#allocation9], 4294963184  ;;  %v101_v0 = vld [vmem:[#allocation2] sm:$0xff]  ;;  %v847_v2 = vmov 0.0   ;;  %v146_v4 = vld [vmem:[#allocation7 + $0x68] sm:$0xff]  ;;  %v108_v6 = vlaneseq  ;;  %vm848_vm1 = vmmov 0  }
  0x3f   :  { %104 = vadd.xlane.f32.xlu0 %v101_v0  ;;  %v148_v1 = vld [vmem:[#allocation7 + $0x78] sm:$0xff]  ;;  %589 = vmatprep.subr.mxu0 %v847_v2  ;;  %v147_v3 = vld [vmem:[#allocation7 + $0x70] sm:$0xff]  ;;  %v145_v5 = vld [vmem:[#allocation7 + $0x60] sm:$0xff]  ;;  %s849_s16 = smov [#allocation11]  }
  0x40   :  { %624 = vmatprep.subr.mxu1 %v847_v2  ;;  %590 = vmatpush3.msra.mxu0 %v148_v1  ;;  %v109_v7 = vand.u32 127, %v108_v6  ;;  %v144_v13 = vld [vmem:[#allocation7 + $0x58] sm:$0xff]  ;;  %v143_v14 = vld [vmem:[#allocation7 + $0x50] sm:$0xff]  ;;  %v142_v15 = vld [vmem:[#allocation7 + $0x48] sm:$0xff]  ;;  %s513_s4 = sshll.u32 %s849_s16, 4  ;;  %s514_s4 = int_to_ptr.vmem [resolvable:$true] %s513_s4 }
  0x41   :  { %591 = vmatprep.subr.mxu0 %v847_v2  ;;  %v141_v16 = vld [vmem:[#allocation7 + $0x40] sm:$0xff]  ;;  %621 = vmatprep.mubr.msk.f32.mxu0 %vm848_vm1, %v847_v2  ;;  %v140_v17 = vld [vmem:[#allocation7 + $0x38] sm:$0xff]  ;;  %v139_v18 = vld [vmem:[#allocation7 + $0x30] sm:$0xff]  ;;  %s812_s17 = scalar_lea.vmem %s514_s4, 128  ;;  %p817_p12 = scmp.lt.s32.totalorder %s514_s4, %s514_s4 }
  0x42   :  { %592 = vmatpush3.msra.mxu0 %v147_v3  ;;  %vm110_vm0 = vcmp.lt.s32.totalorder %v109_v7, 20  ;;  %656 = vmatprep.mubr.msk.f32.mxu1 %vm848_vm1, %v847_v2  ;;  %v138_v19 = vld [vmem:[#allocation7 + $0x28] sm:$0xff]  ;;  %v137_v20 = vld [vmem:[#allocation7 + $0x20] sm:$0xff]  ;;  %v136_v21 = vld [vmem:[#allocation7 + $0x18] sm:$0xff]  ;;  %p813_p11 = scmp.ne.s32.totalorder %s514_s4, %s812_s17  ;;  %p818_p13 = scmp.lt.s32.totalorder %s812_s17, %s812_s17 }
  0x43   :  { %593 = vmatprep.subr.mxu0 %v847_v2  ;;  %v135_v22 = vld [vmem:[#allocation7 + $0x10] sm:$0xff]  ;;  %v134_v23 = vld [vmem:[#allocation7 + $0x8] sm:$0xff]  ;;  %v133_v24 = vld [vmem:[#allocation7] sm:$0xff] }
  0x44   :  { %594 = vmatpush3.msra.mxu0 %v146_v4  ;;  %v524_v29 = vld [vmem:[%s1010_s1] ss:$0 sm:$0xff]  ;;  %v525_v31 = vld [vmem:[#allocation5] ss:$0 sm:$0xff]  ;;  %v526_v35 = vld [vmem:[#allocation8] ss:$0 sm:$0xff]  ;;  %p819_p0 = por %p818_p13, %p817_p12 }
  0x45   :  { %595 = vmatprep.subr.mxu0 %v847_v2  ;;  %v271_v34 = vld [vmem:[#allocation10 + $0x78] sm:$0xff]  ;;  %v270_v41 = vld [vmem:[#allocation10 + $0x70] sm:$0xff]  ;;  %v269_v42 = vld [vmem:[#allocation10 + $0x68] sm:$0xff] }
  0x46   :  { %596 = vmatpush3.msra.mxu0 %v145_v5  ;;  %625 = vmatpush3.msra.mxu1 %v271_v34  ;;  %v268_v43 = vld [vmem:[#allocation10 + $0x60] sm:$0xff]  ;;  %v267_v44 = vld [vmem:[#allocation10 + $0x58] sm:$0xff]  ;;  %v266_v45 = vld [vmem:[#allocation10 + $0x50] sm:$0xff]  ;;  %p820_p1 = pnand %p819_p0, %p813_p11 }
  0x47   :  { %597 = vmatprep.subr.mxu0 %v847_v2  ;;  %626 = vmatprep.subr.mxu1 %v847_v2  ;;  %v265_v46 = vld [vmem:[#allocation10 + $0x48] sm:$0xff]  ;;  %v264_v47 = vld [vmem:[#allocation10 + $0x40] sm:$0xff]  ;;  %v263_v48 = vld [vmem:[#allocation10 + $0x38] sm:$0xff] }
  0x48   :  { %598 = vmatpush3.msra.mxu0 %v144_v13  ;;  %627 = vmatpush3.msra.mxu1 %v270_v41  ;;  %v262_v49 = vld [vmem:[#allocation10 + $0x30] sm:$0xff]  ;;  %v261_v50 = vld [vmem:[#allocation10 + $0x28] sm:$0xff]  ;;  %v260_v51 = vld [vmem:[#allocation10 + $0x20] sm:$0xff] }
  0x49   :  { %599 = vmatprep.subr.mxu0 %v847_v2  ;;  %628 = vmatprep.subr.mxu1 %v847_v2  ;;  %v259_v52 = vld [vmem:[#allocation10 + $0x18] sm:$0xff]  ;;  %v258_v53 = vld [vmem:[#allocation10 + $0x10] sm:$0xff]  ;;  %v257_v54 = vld [vmem:[#allocation10 + $0x8] sm:$0xff] }
  0x4a   :  { %600 = vmatpush3.msra.mxu0 %v143_v14  ;;  %629 = vmatpush3.msra.mxu1 %v269_v42  ;;  %v256_v55 = vld [vmem:[#allocation10] sm:$0xff]  ;;  %v527_v1 = vld [vmem:[%s1014_s5] ss:$0 sm:$0xff]  ;;  %v395_v7 = vld [vmem:[#allocation10 + $0xf8] sm:$0xff] }
  0x4b   :  { %601 = vmatprep.subr.mxu0 %v847_v2  ;;  %630 = vmatprep.subr.mxu1 %v847_v2  ;;  %v528_v4 = vld [vmem:[%s1015_s6] ss:$0 sm:$0xff]  ;;  %v533_v42 = vld [vmem:[%s1017_s8 + $0x1] ss:$0 sm:$0xff] }
  0x4c   :  { %602 = vmatpush3.msra.mxu0 %v142_v15  ;;  %631 = vmatpush3.msra.mxu1 %v268_v43  ;;  %v393_v15 = vld [vmem:[#allocation10 + $0xe8] sm:$0xff] }
  0x4d   :  { %603 = vmatprep.subr.mxu0 %v847_v2  ;;  %632 = vmatprep.subr.mxu1 %v847_v2 }
  0x4e   :  { %604 = vmatpush3.msra.mxu0 %v141_v16  ;;  %633 = vmatpush3.msra.mxu1 %v267_v44  ;;  %v392_v16 = vld [vmem:[#allocation10 + $0xe0] sm:$0xff] }
  0x4f   :  { %605 = vmatprep.subr.mxu0 %v847_v2  ;;  %634 = vmatprep.subr.mxu1 %v847_v2 }
  0x50   :  { %606 = vmatpush3.msra.mxu0 %v140_v17  ;;  %635 = vmatpush3.msra.mxu1 %v266_v45  ;;  %v391_v17 = vld [vmem:[#allocation10 + $0xd8] sm:$0xff] }
  0x51   :  { %607 = vmatprep.subr.mxu0 %v847_v2  ;;  %636 = vmatprep.subr.mxu1 %v847_v2 }
  0x52   :  { %608 = vmatpush3.msra.mxu0 %v139_v18  ;;  %637 = vmatpush3.msra.mxu1 %v265_v46  ;;  %v390_v18 = vld [vmem:[#allocation10 + $0xd0] sm:$0xff] }
  0x53   :  { %609 = vmatprep.subr.mxu0 %v847_v2  ;;  %638 = vmatprep.subr.mxu1 %v847_v2 }
  0x54   :  { %610 = vmatpush3.msra.mxu0 %v138_v19  ;;  %639 = vmatpush3.msra.mxu1 %v264_v47  ;;  %v389_v19 = vld [vmem:[#allocation10 + $0xc8] sm:$0xff] }
  0x55   :  { %611 = vmatprep.subr.mxu0 %v847_v2  ;;  %640 = vmatprep.subr.mxu1 %v847_v2 }
  0x56   :  { %612 = vmatpush3.msra.mxu0 %v137_v20  ;;  %641 = vmatpush3.msra.mxu1 %v263_v48  ;;  %v388_v20 = vld [vmem:[#allocation10 + $0xc0] sm:$0xff] }
  0x57   :  { %613 = vmatprep.subr.mxu0 %v847_v2  ;;  %642 = vmatprep.subr.mxu1 %v847_v2 }
  0x58   :  { %614 = vmatpush3.msra.mxu0 %v136_v21  ;;  %643 = vmatpush3.msra.mxu1 %v262_v49  ;;  %v387_v21 = vld [vmem:[#allocation10 + $0xb8] sm:$0xff] }
  0x59   :  { %615 = vmatprep.subr.mxu0 %v847_v2  ;;  %644 = vmatprep.subr.mxu1 %v847_v2 }
  0x5a   :  { %616 = vmatpush3.msra.mxu0 %v135_v22  ;;  %645 = vmatpush3.msra.mxu1 %v261_v50  ;;  %v386_v22 = vld [vmem:[#allocation10 + $0xb0] sm:$0xff] }
  0x5b   :  { %617 = vmatprep.subr.mxu0 %v847_v2  ;;  %646 = vmatprep.subr.mxu1 %v847_v2 }
  0x5c   :  { %618 = vmatpush3.msra.mxu0 %v134_v23  ;;  %647 = vmatpush3.msra.mxu1 %v260_v51  ;;  %v385_v23 = vld [vmem:[#allocation10 + $0xa8] sm:$0xff] }
  0x5d   :  { %619 = vmatprep.subr.mxu0 %v847_v2  ;;  %648 = vmatprep.subr.mxu1 %v847_v2 }
  0x5e   :  { %620 = vmatpush3.msra.mxu0 %v133_v24  ;;  %649 = vmatpush3.msra.mxu1 %v259_v52  ;;  %v384_v24 = vld [vmem:[#allocation10 + $0xa0] sm:$0xff] }
  0x5f   :  { %659 = vmatprep.subr.mxu0 %v847_v2  ;;  %650 = vmatprep.subr.mxu1 %v847_v2 }
  0x60   :  { %651 = vmatpush3.msra.mxu1 %v258_v53 }
  0x61   :  { %652 = vmatprep.subr.mxu1 %v847_v2 }
  0x62   :  { %653 = vmatpush3.msra.mxu1 %v257_v54 }
  0x63   :  { %654 = vmatprep.subr.mxu1 %v847_v2 }
  0x64   :  { %655 = vmatpush3.msra.mxu1 %v256_v55 }
  0xc8   :  { %v105_v8 = vpop.xlane.xlu0 %104 }
  0xc9   :  { %v106_v9 = vmul.f32 0.05, %v105_v8  ;;  %v394_v8 = vld [vmem:[#allocation10 + $0xf0] sm:$0xff] }
  0xcb   :  { %v107_v10 = vsub.f32 %v101_v0, %v106_v9  ;;  %v529_v9 = vld [vmem:[%s1017_s8] ss:$0 sm:$0xff] }
  0xcd   :  { %v111_v11 = vsel %vm110_vm0, %v107_v10, 0.0 }
  0xce   :  { %v112_v12 = vmul.f32 %v111_v11, %v111_v11 }
  0xd0   :  { %113 = vadd.xlane.f32.xlu0 %v112_v12 }
 0x159   :  { %v114_v25 = vpop.xlane.xlu0 %113 }
 0x15a   :  { %v115_v26 = vmul.f32 0.05, %v114_v25  ;;  %v383_v25 = vld [vmem:[#allocation10 + $0x98] sm:$0xff] }
 0x15c   :  { %v116_v27 = vadd.f32 1e-05, %v115_v26  ;;  %v382_v26 = vld [vmem:[#allocation10 + $0x90] sm:$0xff] }
 0x15e   :  { %704 = vrsqrt.f32 %v116_v27  ;;  %v381_v27 = vld [vmem:[#allocation10 + $0x88] sm:$0xff] }
 0x16b   :  { %v705_v28 = vpop.eup %704 }
 0x16c   :  { %v118_v30 = vmul.f32 %v705_v28, %v111_v11  ;;  %v380_v28 = vld [vmem:[#allocation10 + $0x80] sm:$0xff] }
 0x16e   :  { %v125_v32 = vmul.f32 %v524_v29, %v118_v30 }
 0x170   :  { %v132_v33 = vadd.f32 %v525_v31, %v125_v32 }
 0x172   :  { %622 = vmatmul.mubr.f32.vlgmr.msra.gmra.mxu0 %v132_v33 }
 0x173   :  { %691 = vmatprep.mubr.msk.f32.mxu0 %vm848_vm1, %v847_v2  ;;  %660 = vmatpush3.msra.mxu0 %v395_v7 }
 0x174   :  { %661 = vmatprep.subr.mxu0 %v847_v2 }
 0x175   :  { %662 = vmatpush3.msra.mxu0 %v394_v8 }
 0x176   :  { %663 = vmatprep.subr.mxu0 %v847_v2 }
 0x177   :  { %664 = vmatpush3.msra.mxu0 %v393_v15 }
 0x178   :  { %665 = vmatprep.subr.mxu0 %v847_v2 }
 0x179   :  { %666 = vmatpush3.msra.mxu0 %v392_v16 }
 0x17a   :  { %667 = vmatprep.subr.mxu0 %v847_v2 }
 0x17b   :  { %668 = vmatpush3.msra.mxu0 %v391_v17 }
 0x17c   :  { %669 = vmatprep.subr.mxu0 %v847_v2 }
 0x17d   :  { %670 = vmatpush3.msra.mxu0 %v390_v18 }
 0x17e   :  { %671 = vmatprep.subr.mxu0 %v847_v2 }
 0x17f   :  { %672 = vmatpush3.msra.mxu0 %v389_v19 }
 0x180   :  { %673 = vmatprep.subr.mxu0 %v847_v2 }
 0x181   :  { %674 = vmatpush3.msra.mxu0 %v388_v20 }
 0x182   :  { %675 = vmatprep.subr.mxu0 %v847_v2 }
 0x183   :  { %676 = vmatpush3.msra.mxu0 %v387_v21 }
 0x184   :  { %677 = vmatprep.subr.mxu0 %v847_v2 }
 0x185   :  { %678 = vmatpush3.msra.mxu0 %v386_v22 }
 0x186   :  { %679 = vmatprep.subr.mxu0 %v847_v2 }
 0x187   :  { %680 = vmatpush3.msra.mxu0 %v385_v23 }
 0x188   :  { %681 = vmatprep.subr.mxu0 %v847_v2 }
 0x189   :  { %682 = vmatpush3.msra.mxu0 %v384_v24 }
 0x18a   :  { %683 = vmatprep.subr.mxu0 %v847_v2 }
 0x18b   :  { %684 = vmatpush3.msra.mxu0 %v383_v25 }
 0x18c   :  { %685 = vmatprep.subr.mxu0 %v847_v2 }
 0x18d   :  { %686 = vmatpush3.msra.mxu0 %v382_v26 }
 0x18e   :  { %687 = vmatprep.subr.mxu0 %v847_v2 }
 0x18f   :  { %688 = vmatpush3.msra.mxu0 %v381_v27 }
 0x190   :  { %689 = vmatprep.subr.mxu0 %v847_v2  ;;  %v531_v2 = vld [vmem:[%s1019_s10] ss:$0 sm:$0xff] }
 0x191   :  { %690 = vmatpush3.msra.mxu0 %v380_v28 }
 0x232   :  { %v222_v36 = vpop.f32.mrf.mxu0 }
 0x233   :  { %v223_v37 = vadd.f32 %v526_v35, %v222_v36 }
 0x234   :  { %v623_v38 = vpop.f32.mrf.mxu0 }
 0x235   :  { %v226_v39 = vmax.f32 %v223_v37, 0.0  ;;  %v530_v38 = vld [vmem:[%s1018_s9] ss:$0 sm:$0xff] }
 0x237   :  { %229 = vadd.xlane.f32.xlu1 %v226_v39  ;;  %v231_v40 = vmul.f32 %v226_v39, %v226_v39 }
 0x23b   :  { %232 = vadd.xlane.f32.xlu1 %v231_v40 }
 0x2c0   :  { %v230_v56 = vpop.xlane.xlu1 %229 }
 0x2c1   :  { %v234_v57 = vmul.f32 0.015625, %v230_v56 }
 0x2c3   :  { %v236_v59 = vmul.f32 %v234_v57, %v234_v57  ;;  %v240_v63 = vsub.f32 %v226_v39, %v234_v57  ;;  %v536_v57 = vld [vmem:[%s1018_s9 + $0x1] ss:$0 sm:$0xff] }
 0x2c4   :  { %v233_v58 = vpop.xlane.xlu1 %232 }
 0x2c5   :  { %v235_v60 = vmul.f32 0.015625, %v233_v58 }
 0x2c7   :  { %v237_v61 = vsub.f32 %v235_v60, %v236_v59  ;;  %v537_v59 = vld [vmem:[%s1019_s10 + $0x1] ss:$0 sm:$0xff] }
 0x2c9   :  { %v238_v62 = vadd.f32 1e-05, %v237_v61 }
 0x2cb   :  { %706 = vrsqrt.f32 %v238_v62 }
 0x2d8   :  { %v707_v0 = vpop.eup %706 }
 0x2d9   :  { %v241_v3 = vmul.f32 %v707_v0, %v240_v63 }
 0x2db   :  { %v248_v5 = vmul.f32 %v527_v1, %v241_v3 }
 0x2dd   :  { %v255_v6 = vadd.f32 %v528_v4, %v248_v5 }
 0x2df   :  { %657 = vmatmul.mubr.f32.vlgmr.msra.gmra.mxu1 %v255_v6 }
 0x39f   :  { %v345_v10 = vpop.f32.mrf.mxu1 }
 0x3a0   :  { %v346_v11 = vadd.f32 %v529_v9, %v345_v10 }
 0x3a1   :  { %v658_v12 = vpop.f32.mrf.mxu1 }
 0x3a2   :  { %v349_v13 = vmax.f32 %v346_v11, 0.0 }
 0x3a4   :  { %352 = vadd.xlane.f32.xlu0 %v349_v13  ;;  %v354_v14 = vmul.f32 %v349_v13, %v349_v13 }
 0x3a6   :  { %355 = vadd.xlane.f32.xlu1 %v354_v14 }
 0x42d   :  { %v353_v29 = vpop.xlane.xlu0 %352 }
 0x42e   :  { %v357_v30 = vmul.f32 0.015625, %v353_v29 }
 0x42f   :  { %v356_v31 = vpop.xlane.xlu1 %355 }
 0x430   :  { %v359_v32 = vmul.f32 %v357_v30, %v357_v30  ;;  %v358_v33 = vmul.f32 0.015625, %v356_v31  ;;  %v363_v36 = vsub.f32 %v349_v13, %v357_v30 }
 0x432   :  { %v360_v34 = vsub.f32 %v358_v33, %v359_v32 }
 0x434   :  { %v361_v35 = vadd.f32 1e-05, %v360_v34 }
 0x436   :  { %708 = vrsqrt.f32 %v361_v35 }
 0x443   :  { %v709_v37 = vpop.eup %708 }
 0x444   :  { %v364_v39 = vmul.f32 %v709_v37, %v363_v36 }
 0x446   :  { %v371_v40 = vmul.f32 %v530_v38, %v364_v39 }
 0x448   :  { %v378_v41 = vadd.f32 %v531_v2, %v371_v40 }
 0x44a   :  { %692 = vmatmul.mubr.f32.vlgmr.msra.gmra.mxu0 %v378_v41 }
 0x50a   :  { %v470_v43 = vpop.f32.mrf.mxu0 }
 0x50b   :  { %v471_v44 = vadd.f32 %v533_v42, %v470_v43 }
 0x50c   :  { %v693_v45 = vpop.f32.mrf.mxu0 }
 0x50d   :  { %v474_v46 = vmax.f32 %v471_v44, 0.0 }
 0x50f   :  { %479 = vadd.xlane.f32.xlu0 %v474_v46  ;;  %v481_v47 = vmul.f32 %v474_v46, %v474_v46 }
 0x511   :  { %482 = vadd.xlane.f32.xlu1 %v481_v47 }
 0x598   :  { %v480_v48 = vpop.xlane.xlu0 %479 }
 0x599   :  { %v484_v49 = vmul.f32 0.015625, %v480_v48 }
 0x59a   :  { %v483_v50 = vpop.xlane.xlu1 %482 }
 0x59b   :  { %v486_v51 = vmul.f32 %v484_v49, %v484_v49  ;;  %v485_v52 = vmul.f32 0.015625, %v483_v50  ;;  %v490_v55 = vsub.f32 %v474_v46, %v484_v49 }
 0x59d   :  { %v487_v53 = vsub.f32 %v485_v52, %v486_v51 }
 0x59f   :  { %v488_v54 = vadd.f32 1e-05, %v487_v53 }
 0x5a1   :  { %710 = vrsqrt.f32 %v488_v54 }
 0x5ae   :  { %v711_v56 = vpop.eup %710 }
 0x5af   :  { %v491_v58 = vmul.f32 %v711_v56, %v490_v55 }
 0x5b1   :  { %v498_v60 = vmul.f32 %v536_v57, %v491_v58 }
 0x5b3   :  { %v505_v61 = vadd.f32 %v537_v59, %v498_v60 }
 0x5b5   :  { %506 = vst [vmem:[#allocation11] sm:$0xff] %v505_v61 }
 0x5b6   :  { %823 = shalt.err (!%p820_p1)
}
 0x5b7   :  { %516 = dma.vmem_to_hbm [thread:$0]  %s514_s4, 128, %s1020_s11, [#allocation4]  }
 0x5b8   :  { %838 = dma.done.wait [#allocation4], 128  }
 0x5b9   :  { %839 = vsyncadd [#allocation4], 4294967168 }
 0x5ba   :  { %520 = vsyncpa [#allocation3], 1 }
 0x5bb   :  { %521 = vsyncpa [#allocation6], 1 }
 0x5bc   :  { %522 = vsyncpa [#allocation9], 1 }
 0x5bd   :  { %523 = vsyncpa [#allocation4], 1 }

</bundles_post_ra>
